<compile_context>
chip_gen: v6e
topology: v6e:2x2x1
jax: 0.10.0
libtpu: 0.0.40
codegen_flags: <defaults>
</compile_context>

<pallas_src>
import math
import numpy as np
import jax
import jax.numpy as jnp
from jax.experimental import pallas as pl
from jax.experimental.pallas import tpu as pltpu

# ----------------------- small synthetic config -----------------------------
B, N, D, H = 2, 8, 32, 4          # batch, nodes, encoder_embed_dim, heads
HD = D // H
SCALING = 1.0 / math.sqrt(HD)     # (embed_dim // num_heads) ** -0.5
_NEG_INF = float(jnp.finfo(jnp.float32).min)   # torch.finfo(dtype).min


# ------------------------------- kernel --------------------------------------
def _nodetaskhead_kernel(x_ref, pcol_ref, prow_ref, bias_ref, qmask_ref, kmask_ref,
                         wq_ref, wk_ref, wv_ref, wve_ref, wo_ref, woe_ref,
                         out_x_ref, out_vec_ref):
    x = x_ref[0]                       # (N, D)
    qmask = qmask_ref[0]               # (N, 1)  1.0 == padded query token
    kmask = kmask_ref[0]               # (1, N)  1.0 == padded key token

    # pairwise displacement & distance: one (N, N) map per coordinate.
    # pcol/prow are leading-dim indexed -> pure VPU broadcast arithmetic.
    d = [pcol_ref[0, c] - prow_ref[0, c] for c in range(3)]        # 3 x (N, N)
    dist = jnp.sqrt(d[0] * d[0] + d[1] * d[1] + d[2] * d[2])
    dist = jnp.where(qmask > 0.5, 1e6, dist)                       # masked_fill (query)
    dist = jnp.where(kmask > 0.5, 1e6, dist)                       # masked_fill (key)
    inv = 1.0 / (dist + 1.0)
    # normalized delta_pos, zeroed for padded query rows
    ud = [jnp.where(qmask > 0.5, 0.0, dc * inv) for dc in d]

    acc_x = jnp.zeros((N, D), jnp.float32)
    acc_v = [jnp.zeros((N, D), jnp.float32) for _ in range(3)]

    # Static loop over heads.  Per-head weights are indexed on the leading
    # (untiled) axis and head-merge is done by accumulating o_proj partials,
    # so there is no lane slicing, no concatenate, no relayout.
    for h in range(H):
        qh = jnp.dot(x, wq_ref[h], preferred_element_type=jnp.float32) * SCALING
        kh = jnp.dot(x, wk_ref[h], preferred_element_type=jnp.float32)
        vh = jnp.dot(x, wv_ref[h], preferred_element_type=jnp.float32)
        veh = jnp.dot(x, wve_ref[h], preferred_element_type=jnp.float32)

        # q @ k^T  (contract last dims of both -> no explicit transpose)
        s = jax.lax.dot_general(qh, kh, (((1,), (1,)), ((), ())),
                                preferred_element_type=jnp.float32)
        s = s + bias_ref[0, h]
        s = jnp.where(kmask > 0.5, _NEG_INF, s)
        s = jnp.where(qmask > 0.5, _NEG_INF, s)
        m = jnp.max(s, axis=-1, keepdims=True)
        e = jnp.exp(s - m)
        p = e / jnp.sum(e, axis=-1, keepdims=True)                 # (N, N)

        # energy/feature branch: (p @ v_e_h) @ Wo_e[h-block]
        acc_x = acc_x + jnp.dot(
            jnp.dot(p, veh, preferred_element_type=jnp.float32),
            woe_ref[h], preferred_element_type=jnp.float32)

        # equivariant branch: one (N, D) slab per coordinate
        for c in range(3):
            pc = p * ud[c]
            acc_v[c] = acc_v[c] + jnp.dot(
                jnp.dot(pc, vh, preferred_element_type=jnp.float32),
                wo_ref[h], preferred_element_type=jnp.float32)

    out_x_ref[0] = acc_x
    for c in range(3):
        out_vec_ref[0, c] = acc_v[c]


# ------------------------------ wrapper ---------------------------------------
def nodetaskhead_forward(params, batched_data, x, attn_bias, padding_mask):
    """x: [N, B, D] seq-first (PyTorch convention). Returns
    (decoder_x_output [B,N,D], decoder_vec_output [B,N,3,D])."""
    xt = jnp.transpose(x, (1, 0, 2)).astype(jnp.float32)            # (B, N, D)
    pos = batched_data['pos'].astype(jnp.float32)                   # (B, N, 3)
    pos_t = jnp.transpose(pos, (0, 2, 1))                           # (B, 3, N)
    pos_cols = pos_t[:, :, :, None]                                 # (B, 3, N, 1)
    pos_rows = pos_t[:, :, None, :]                                 # (B, 3, 1, N)
    qmask = padding_mask.astype(jnp.float32)[:, :, None]            # (B, N, 1)
    kmask = padding_mask.astype(jnp.float32)[:, None, :]            # (B, 1, N)

    # per-head weight stacks (heads on a leading axis)
    def split_in(w):    # (D, D) -> (H, D, HD)   output columns per head
        return w.reshape(D, H, HD).transpose(1, 0, 2)

    def split_out(w):   # (D, D) -> (H, HD, D)   input rows per head
        return w.reshape(H, HD, D)

    w_qh = split_in(params['w_q'])
    w_kh = split_in(params['w_k'])
    w_vh = split_in(params['w_v'])
    w_veh = split_in(params['w_ve'])
    w_oh = split_out(params['w_o'])
    w_oeh = split_out(params['w_oe'])

    wspec_in = pl.BlockSpec((H, D, HD), lambda b: (0, 0, 0))
    wspec_out = pl.BlockSpec((H, HD, D), lambda b: (0, 0, 0))

    out_x, out_vec = pl.pallas_call(
        _nodetaskhead_kernel,
        out_shape=(jax.ShapeDtypeStruct((B, N, D), jnp.float32),
                   jax.ShapeDtypeStruct((B, 3, N, D), jnp.float32)),
        grid=(B,),
        in_specs=[
            pl.BlockSpec((1, N, D), lambda b: (b, 0, 0)),           # x
            pl.BlockSpec((1, 3, N, 1), lambda b: (b, 0, 0, 0)),     # pos columns
            pl.BlockSpec((1, 3, 1, N), lambda b: (b, 0, 0, 0)),     # pos rows
            pl.BlockSpec((1, H, N, N), lambda b: (b, 0, 0, 0)),     # attn bias
            pl.BlockSpec((1, N, 1), lambda b: (b, 0, 0)),           # query pad mask
            pl.BlockSpec((1, 1, N), lambda b: (b, 0, 0)),           # key pad mask
            wspec_in, wspec_in, wspec_in, wspec_in,                 # wq, wk, wv, wve
            wspec_out, wspec_out,                                   # wo, woe
        ],
        out_specs=(pl.BlockSpec((1, N, D), lambda b: (b, 0, 0)),
                   pl.BlockSpec((1, 3, N, D), lambda b: (b, 0, 0, 0))),
        compiler_params=pltpu.CompilerParams(dimension_semantics=("parallel",)),
    )(xt, pos_cols, pos_rows, attn_bias.astype(jnp.float32), qmask, kmask,
      w_qh, w_kh, w_vh, w_veh, w_oh, w_oeh)

    decoder_x_output = out_x                                        # (B, N, D)
    decoder_vec_output = jnp.transpose(out_vec, (0, 2, 1, 3))       # (B, N, 3, D)
    return decoder_x_output, decoder_vec_output


# ----------------------- pure-JAX reference -----------------------------------
def reference_forward(params, batched_data, x, attn_bias, padding_mask):
    xt = jnp.transpose(x, (1, 0, 2)).astype(jnp.float32)            # (B, N, D)
    pos = batched_data['pos'].astype(jnp.float32)
    delta = pos[:, :, None, :] - pos[:, None, :, :]                 # (B, N, N, 3)
    dist = jnp.sqrt(jnp.sum(delta * delta, axis=-1))                # (B, N, N)
    dist = jnp.where(padding_mask[:, :, None], 1e6, dist)
    dist = jnp.where(padding_mask[:, None, :], 1e6, dist)
    delta = delta / (dist[..., None] + 1.0)

    q = (xt @ params['w_q']) * SCALING
    k = xt @ params['w_k']
    v = xt @ params['w_v']
    v_e = xt @ params['w_ve']
    q = q.reshape(B, N, H, HD).transpose(0, 2, 1, 3)
    k = k.reshape(B, N, H, HD).transpose(0, 2, 1, 3)
    v = v.reshape(B, N, H, HD).transpose(0, 2, 1, 3)
    v_e = v_e.reshape(B, N, H, HD).transpose(0, 2, 1, 3)

    attn = jnp.einsum('bhqd,bhkd->bhqk', q, k) + attn_bias
    attn = jnp.where(padding_mask[:, None, None, :], _NEG_INF, attn)
    attn = jnp.where(padding_mask[:, None, :, None], _NEG_INF, attn)
    probs = jax.nn.softmax(attn, axis=-1)

    delta = jnp.where(padding_mask[:, :, None, None], 0.0, delta)
    rot = probs[..., None] * delta[:, None]                         # (B, H, N, N, 3)
    rot = jnp.transpose(rot, (0, 1, 4, 2, 3))                       # (B, H, 3, N, N)
    vec = jnp.einsum('bhcqk,bhkd->bhcqd', rot, v)                   # (B, H, 3, N, HD)
    vec = jnp.transpose(vec, (0, 3, 2, 1, 4)).reshape(B, N, 3, D)
    vec = vec @ params['w_o']

    xo = jnp.einsum('bhqk,bhkd->bhqd', probs, v_e)
    xo = jnp.transpose(xo, (0, 2, 1, 3)).reshape(B, N, D)
    xo = xo @ params['w_oe']
    return xo, vec


# ------------------------------ params ----------------------------------------
def init_params(key):
    ks = jax.random.split(key, 6)

    def nrm(k, shape, s=0.1):
        return jax.random.normal(k, shape, jnp.float32) * s

    # NOTE: weights stored as [in, out] (bias=False Linear layers)
    return {
        'w_q': nrm(ks[0], (D, D)),
        'w_k': nrm(ks[1], (D, D)),
        'w_v': nrm(ks[2], (D, D)),
        'w_ve': nrm(ks[3], (D, D)),    # v_proj_energy  (decoder_feat4energy=True)
        'w_o': nrm(ks[4], (D, D)),
        'w_oe': nrm(ks[5], (D, D)),    # o_proj_energy
    }


# -------------------------------- main -----------------------------------------
if __name__ == "__main__":
    key = jax.random.PRNGKey(0)
    kp, kx, kpos, kb = jax.random.split(key, 4)
    params = init_params(kp)

    x = jax.random.normal(kx, (N, B, D), jnp.float32)               # seq-first, like torch
    pos = jax.random.normal(kpos, (B, N, 3), jnp.float32) * 3.0
    attn_bias = jax.random.normal(kb, (B, H, N, N), jnp.float32) * 0.1
    padding_mask = (jnp.zeros((B, N), jnp.bool_)
                    .at[1, N - 1].set(True)
                    .at[1, N - 2].set(True))
    batched_data = {'pos': pos}

    fwd = jax.jit(nodetaskhead_forward)
    out_x, out_vec = fwd(params, batched_data, x, attn_bias, padding_mask)
    out_x = jax.block_until_ready(out_x)
    out_vec = jax.block_until_ready(out_vec)

    ref_x, ref_vec = reference_forward(params, batched_data, x, attn_bias, padding_mask)
    np.testing.assert_allclose(np.asarray(out_x), np.asarray(ref_x), rtol=2e-3, atol=2e-3)
    np.testing.assert_allclose(np.asarray(out_vec), np.asarray(ref_vec), rtol=2e-3, atol=2e-3)
    print("KERNEL_OK")
</pallas_src>

<mosaic_0001>
module attributes {stable_mosaic.version = 11 : i64} {
  func.func @_nodetaskhead_kernel(%arg0: i32, %arg1: memref<1x8x32xf32, #tpu.memory_space<vmem>>, %arg2: memref<1x3x8x1xf32, #tpu.memory_space<vmem>>, %arg3: memref<1x3x1x8xf32, #tpu.memory_space<vmem>>, %arg4: memref<1x4x8x8xf32, #tpu.memory_space<vmem>>, %arg5: memref<1x8x1xf32, #tpu.memory_space<vmem>>, %arg6: memref<1x1x8xf32, #tpu.memory_space<vmem>>, %arg7: memref<4x32x8xf32, #tpu.memory_space<vmem>>, %arg8: memref<4x32x8xf32, #tpu.memory_space<vmem>>, %arg9: memref<4x32x8xf32, #tpu.memory_space<vmem>>, %arg10: memref<4x32x8xf32, #tpu.memory_space<vmem>>, %arg11: memref<4x8x32xf32, #tpu.memory_space<vmem>>, %arg12: memref<4x8x32xf32, #tpu.memory_space<vmem>>, %arg13: memref<1x8x32xf32, #tpu.memory_space<vmem>>, %arg14: memref<1x3x8x32xf32, #tpu.memory_space<vmem>>) attributes {dimension_semantics = [#tpu.dimension_semantics<parallel>], iteration_bounds = array<i64: 2>, scalar_prefetch = 0 : i64, scratch_operands = 0 : i64, tpu.core_type = #tpu.core_type<tc>, window_params = [{transform_indices = @transform_0, window_bounds = array<i64: 1, 8, 32>}, {transform_indices = @transform_1, window_bounds = array<i64: 1, 3, 8, 1>}, {transform_indices = @transform_2, window_bounds = array<i64: 1, 3, 1, 8>}, {transform_indices = @transform_3, window_bounds = array<i64: 1, 4, 8, 8>}, {transform_indices = @transform_4, window_bounds = array<i64: 1, 8, 1>}, {transform_indices = @transform_5, window_bounds = array<i64: 1, 1, 8>}, {pipeline_mode = #tpu.pipeline_mode<synchronous>, transform_indices = @transform_6, window_bounds = array<i64: 4, 32, 8>}, {pipeline_mode = #tpu.pipeline_mode<synchronous>, transform_indices = @transform_7, window_bounds = array<i64: 4, 32, 8>}, {pipeline_mode = #tpu.pipeline_mode<synchronous>, transform_indices = @transform_8, window_bounds = array<i64: 4, 32, 8>}, {pipeline_mode = #tpu.pipeline_mode<synchronous>, transform_indices = @transform_9, window_bounds = array<i64: 4, 32, 8>}, {pipeline_mode = #tpu.pipeline_mode<synchronous>, transform_indices = @transform_10, window_bounds = array<i64: 4, 8, 32>}, {pipeline_mode = #tpu.pipeline_mode<synchronous>, transform_indices = @transform_11, window_bounds = array<i64: 4, 8, 32>}, {transform_indices = @transform_12, window_bounds = array<i64: 1, 8, 32>}, {transform_indices = @transform_13, window_bounds = array<i64: 1, 3, 8, 32>}]} {
    %c0 = arith.constant 0 : index
    %c0_0 = arith.constant 0 : index
    %c0_1 = arith.constant 0 : index
    %0 = vector.load %arg1[%c0, %c0_0, %c0_1] : memref<1x8x32xf32, #tpu.memory_space<vmem>>, vector<1x8x32xf32>
    %1 = vector.shape_cast %0 : vector<1x8x32xf32> to vector<8x32xf32>
    %c0_2 = arith.constant 0 : index
    %c0_3 = arith.constant 0 : index
    %c0_4 = arith.constant 0 : index
    %2 = vector.load %arg5[%c0_2, %c0_3, %c0_4] : memref<1x8x1xf32, #tpu.memory_space<vmem>>, vector<1x8x1xf32>
    %3 = vector.shape_cast %2 : vector<1x8x1xf32> to vector<8x1xf32>
    %c0_5 = arith.constant 0 : index
    %c0_6 = arith.constant 0 : index
    %c0_7 = arith.constant 0 : index
    %4 = vector.load %arg6[%c0_5, %c0_6, %c0_7] : memref<1x1x8xf32, #tpu.memory_space<vmem>>, vector<1x1x8xf32>
    %5 = vector.shape_cast %4 : vector<1x1x8xf32> to vector<1x8xf32>
    %c0_8 = arith.constant 0 : index
    %c0_9 = arith.constant 0 : index
    %c0_10 = arith.constant 0 : index
    %c0_11 = arith.constant 0 : index
    %6 = vector.load %arg2[%c0_8, %c0_9, %c0_10, %c0_11] : memref<1x3x8x1xf32, #tpu.memory_space<vmem>>, vector<1x1x8x1xf32>
    %7 = vector.shape_cast %6 : vector<1x1x8x1xf32> to vector<8x1xf32>
    %c0_12 = arith.constant 0 : index
    %c0_13 = arith.constant 0 : index
    %c0_14 = arith.constant 0 : index
    %c0_15 = arith.constant 0 : index
    %8 = vector.load %arg3[%c0_12, %c0_13, %c0_14, %c0_15] : memref<1x3x1x8xf32, #tpu.memory_space<vmem>>, vector<1x1x1x8xf32>
    %9 = vector.shape_cast %8 : vector<1x1x1x8xf32> to vector<1x8xf32>
    %10 = vector.broadcast %7 : vector<8x1xf32> to vector<8x8xf32>
    %11 = vector.broadcast %9 : vector<1x8xf32> to vector<8x8xf32>
    %12 = arith.subf %10, %11 : vector<8x8xf32>
    %c0_16 = arith.constant 0 : index
    %c1 = arith.constant 1 : index
    %c0_17 = arith.constant 0 : index
    %c0_18 = arith.constant 0 : index
    %13 = vector.load %arg2[%c0_16, %c1, %c0_17, %c0_18] : memref<1x3x8x1xf32, #tpu.memory_space<vmem>>, vector<1x1x8x1xf32>
    %14 = vector.shape_cast %13 : vector<1x1x8x1xf32> to vector<8x1xf32>
    %c0_19 = arith.constant 0 : index
    %c1_20 = arith.constant 1 : index
    %c0_21 = arith.constant 0 : index
    %c0_22 = arith.constant 0 : index
    %15 = vector.load %arg3[%c0_19, %c1_20, %c0_21, %c0_22] : memref<1x3x1x8xf32, #tpu.memory_space<vmem>>, vector<1x1x1x8xf32>
    %16 = vector.shape_cast %15 : vector<1x1x1x8xf32> to vector<1x8xf32>
    %17 = vector.broadcast %14 : vector<8x1xf32> to vector<8x8xf32>
    %18 = vector.broadcast %16 : vector<1x8xf32> to vector<8x8xf32>
    %19 = arith.subf %17, %18 : vector<8x8xf32>
    %c0_23 = arith.constant 0 : index
    %c2 = arith.constant 2 : index
    %c0_24 = arith.constant 0 : index
    %c0_25 = arith.constant 0 : index
    %20 = vector.load %arg2[%c0_23, %c2, %c0_24, %c0_25] : memref<1x3x8x1xf32, #tpu.memory_space<vmem>>, vector<1x1x8x1xf32>
    %21 = vector.shape_cast %20 : vector<1x1x8x1xf32> to vector<8x1xf32>
    %c0_26 = arith.constant 0 : index
    %c2_27 = arith.constant 2 : index
    %c0_28 = arith.constant 0 : index
    %c0_29 = arith.constant 0 : index
    %22 = vector.load %arg3[%c0_26, %c2_27, %c0_28, %c0_29] : memref<1x3x1x8xf32, #tpu.memory_space<vmem>>, vector<1x1x1x8xf32>
    %23 = vector.shape_cast %22 : vector<1x1x1x8xf32> to vector<1x8xf32>
    %24 = vector.broadcast %21 : vector<8x1xf32> to vector<8x8xf32>
    %25 = vector.broadcast %23 : vector<1x8xf32> to vector<8x8xf32>
    %26 = arith.subf %24, %25 : vector<8x8xf32>
    %27 = arith.mulf %12, %12 : vector<8x8xf32>
    %28 = arith.mulf %19, %19 : vector<8x8xf32>
    %29 = arith.addf %27, %28 : vector<8x8xf32>
    %30 = arith.mulf %26, %26 : vector<8x8xf32>
    %31 = arith.addf %29, %30 : vector<8x8xf32>
    %32 = math.sqrt %31 : vector<8x8xf32>
    %cst = arith.constant 5.000000e-01 : f32
    %33 = vector.broadcast %cst : f32 to vector<8x1xf32>
    %34 = arith.cmpf ogt, %3, %33 : vector<8x1xf32>
    %cst_30 = arith.constant 1.000000e+06 : f32
    %35 = vector.shape_cast %34 : vector<8x1xi1> to vector<8x1xi1>
    %36 = vector.broadcast %35 : vector<8x1xi1> to vector<8x8xi1>
    %37 = vector.broadcast %cst_30 : f32 to vector<8x8xf32>
    %38 = arith.select %36, %37, %32 : vector<8x8xi1>, vector<8x8xf32>
    %cst_31 = arith.constant 5.000000e-01 : f32
    %39 = vector.broadcast %cst_31 : f32 to vector<1x8xf32>
    %40 = arith.cmpf ogt, %5, %39 : vector<1x8xf32>
    %cst_32 = arith.constant 1.000000e+06 : f32
    %41 = vector.shape_cast %40 : vector<1x8xi1> to vector<1x8xi1>
    %42 = vector.broadcast %41 : vector<1x8xi1> to vector<8x8xi1>
    %43 = vector.broadcast %cst_32 : f32 to vector<8x8xf32>
    %44 = arith.select %42, %43, %38 : vector<8x8xi1>, vector<8x8xf32>
    %cst_33 = arith.constant 1.000000e+00 : f32
    %45 = vector.broadcast %cst_33 : f32 to vector<8x8xf32>
    %46 = arith.addf %44, %45 : vector<8x8xf32>
    %cst_34 = arith.constant 1.000000e+00 : f32
    %47 = vector.broadcast %cst_34 : f32 to vector<8x8xf32>
    %48 = arith.divf %47, %46 : vector<8x8xf32>
    %cst_35 = arith.constant 5.000000e-01 : f32
    %49 = vector.broadcast %cst_35 : f32 to vector<8x1xf32>
    %50 = arith.cmpf ogt, %3, %49 : vector<8x1xf32>
    %51 = arith.mulf %12, %48 : vector<8x8xf32>
    %cst_36 = arith.constant 0.000000e+00 : f32
    %52 = vector.shape_cast %50 : vector<8x1xi1> to vector<8x1xi1>
    %53 = vector.broadcast %52 : vector<8x1xi1> to vector<8x8xi1>
    %54 = vector.broadcast %cst_36 : f32 to vector<8x8xf32>
    %55 = arith.select %53, %54, %51 : vector<8x8xi1>, vector<8x8xf32>
    %cst_37 = arith.constant 5.000000e-01 : f32
    %56 = vector.broadcast %cst_37 : f32 to vector<8x1xf32>
    %57 = arith.cmpf ogt, %3, %56 : vector<8x1xf32>
    %58 = arith.mulf %19, %48 : vector<8x8xf32>
    %cst_38 = arith.constant 0.000000e+00 : f32
    %59 = vector.shape_cast %57 : vector<8x1xi1> to vector<8x1xi1>
    %60 = vector.broadcast %59 : vector<8x1xi1> to vector<8x8xi1>
    %61 = vector.broadcast %cst_38 : f32 to vector<8x8xf32>
    %62 = arith.select %60, %61, %58 : vector<8x8xi1>, vector<8x8xf32>
    %cst_39 = arith.constant 5.000000e-01 : f32
    %63 = vector.broadcast %cst_39 : f32 to vector<8x1xf32>
    %64 = arith.cmpf ogt, %3, %63 : vector<8x1xf32>
    %65 = arith.mulf %26, %48 : vector<8x8xf32>
    %cst_40 = arith.constant 0.000000e+00 : f32
    %66 = vector.shape_cast %64 : vector<8x1xi1> to vector<8x1xi1>
    %67 = vector.broadcast %66 : vector<8x1xi1> to vector<8x8xi1>
    %68 = vector.broadcast %cst_40 : f32 to vector<8x8xf32>
    %69 = arith.select %67, %68, %65 : vector<8x8xi1>, vector<8x8xf32>
    %cst_41 = arith.constant 0.000000e+00 : f32
    %70 = vector.broadcast %cst_41 : f32 to vector<8x32xf32>
    %cst_42 = arith.constant 0.000000e+00 : f32
    %71 = vector.broadcast %cst_42 : f32 to vector<8x32xf32>
    %cst_43 = arith.constant 0.000000e+00 : f32
    %72 = vector.broadcast %cst_43 : f32 to vector<8x32xf32>
    %cst_44 = arith.constant 0.000000e+00 : f32
    %73 = vector.broadcast %cst_44 : f32 to vector<8x32xf32>
    %c0_45 = arith.constant 0 : index
    %c0_46 = arith.constant 0 : index
    %c0_47 = arith.constant 0 : index
    %74 = vector.load %arg7[%c0_45, %c0_46, %c0_47] : memref<4x32x8xf32, #tpu.memory_space<vmem>>, vector<1x32x8xf32>
    %75 = vector.shape_cast %74 : vector<1x32x8xf32> to vector<32x8xf32>
    %cst_48 = arith.constant dense<0.000000e+00> : vector<8x8xf32>
    %76 = tpu.matmul %1, %75, %cst_48 {dimension_numbers = #tpu.dot_dimension_numbers<[1], [0], [0], [1], [0, 0, 1, 1], [], []>} : vector<8x32xf32>, vector<32x8xf32>, vector<8x8xf32> -> vector<8x8xf32>
    %cst_49 = arith.constant 0.353553385 : f32
    %77 = vector.broadcast %cst_49 : f32 to vector<8x8xf32>
    %78 = arith.mulf %76, %77 : vector<8x8xf32>
    %c0_50 = arith.constant 0 : index
    %c0_51 = arith.constant 0 : index
    %c0_52 = arith.constant 0 : index
    %79 = vector.load %arg8[%c0_50, %c0_51, %c0_52] : memref<4x32x8xf32, #tpu.memory_space<vmem>>, vector<1x32x8xf32>
    %80 = vector.shape_cast %79 : vector<1x32x8xf32> to vector<32x8xf32>
    %cst_53 = arith.constant dense<0.000000e+00> : vector<8x8xf32>
    %81 = tpu.matmul %1, %80, %cst_53 {dimension_numbers = #tpu.dot_dimension_numbers<[1], [0], [0], [1], [0, 0, 1, 1], [], []>} : vector<8x32xf32>, vector<32x8xf32>, vector<8x8xf32> -> vector<8x8xf32>
    %c0_54 = arith.constant 0 : index
    %c0_55 = arith.constant 0 : index
    %c0_56 = arith.constant 0 : index
    %82 = vector.load %arg9[%c0_54, %c0_55, %c0_56] : memref<4x32x8xf32, #tpu.memory_space<vmem>>, vector<1x32x8xf32>
    %83 = vector.shape_cast %82 : vector<1x32x8xf32> to vector<32x8xf32>
    %cst_57 = arith.constant dense<0.000000e+00> : vector<8x8xf32>
    %84 = tpu.matmul %1, %83, %cst_57 {dimension_numbers = #tpu.dot_dimension_numbers<[1], [0], [0], [1], [0, 0, 1, 1], [], []>} : vector<8x32xf32>, vector<32x8xf32>, vector<8x8xf32> -> vector<8x8xf32>
    %c0_58 = arith.constant 0 : index
    %c0_59 = arith.constant 0 : index
    %c0_60 = arith.constant 0 : index
    %85 = vector.load %arg10[%c0_58, %c0_59, %c0_60] : memref<4x32x8xf32, #tpu.memory_space<vmem>>, vector<1x32x8xf32>
    %86 = vector.shape_cast %85 : vector<1x32x8xf32> to vector<32x8xf32>
    %cst_61 = arith.constant dense<0.000000e+00> : vector<8x8xf32>
    %87 = tpu.matmul %1, %86, %cst_61 {dimension_numbers = #tpu.dot_dimension_numbers<[1], [0], [0], [1], [0, 0, 1, 1], [], []>} : vector<8x32xf32>, vector<32x8xf32>, vector<8x8xf32> -> vector<8x8xf32>
    %cst_62 = arith.constant dense<0.000000e+00> : vector<8x8xf32>
    %88 = tpu.matmul %78, %81, %cst_62 {dimension_numbers = #tpu.dot_dimension_numbers<[1], [1], [0], [0], [0, 0, 1, 0], [], []>} : vector<8x8xf32>, vector<8x8xf32>, vector<8x8xf32> -> vector<8x8xf32>
    %c0_63 = arith.constant 0 : index
    %c0_64 = arith.constant 0 : index
    %c0_65 = arith.constant 0 : index
    %c0_66 = arith.constant 0 : index
    %89 = vector.load %arg4[%c0_63, %c0_64, %c0_65, %c0_66] : memref<1x4x8x8xf32, #tpu.memory_space<vmem>>, vector<1x1x8x8xf32>
    %90 = vector.shape_cast %89 : vector<1x1x8x8xf32> to vector<8x8xf32>
    %91 = arith.addf %88, %90 : vector<8x8xf32>
    %cst_67 = arith.constant 5.000000e-01 : f32
    %92 = vector.broadcast %cst_67 : f32 to vector<1x8xf32>
    %93 = arith.cmpf ogt, %5, %92 : vector<1x8xf32>
    %cst_68 = arith.constant -3.40282347E+38 : f32
    %94 = vector.shape_cast %93 : vector<1x8xi1> to vector<1x8xi1>
    %95 = vector.broadcast %94 : vector<1x8xi1> to vector<8x8xi1>
    %96 = vector.broadcast %cst_68 : f32 to vector<8x8xf32>
    %97 = arith.select %95, %96, %91 : vector<8x8xi1>, vector<8x8xf32>
    %cst_69 = arith.constant 5.000000e-01 : f32
    %98 = vector.broadcast %cst_69 : f32 to vector<8x1xf32>
    %99 = arith.cmpf ogt, %3, %98 : vector<8x1xf32>
    %cst_70 = arith.constant -3.40282347E+38 : f32
    %100 = vector.shape_cast %99 : vector<8x1xi1> to vector<8x1xi1>
    %101 = vector.broadcast %100 : vector<8x1xi1> to vector<8x8xi1>
    %102 = vector.broadcast %cst_70 : f32 to vector<8x8xf32>
    %103 = arith.select %101, %102, %97 : vector<8x8xi1>, vector<8x8xf32>
    %cst_71 = arith.constant dense<0xFF800000> : vector<8xf32>
    %104 = vector.multi_reduction <maximumf>, %103, %cst_71 [1] : vector<8x8xf32> to vector<8xf32>
    %105 = vector.shape_cast %104 : vector<8xf32> to vector<8x1xf32>
    %106 = vector.broadcast %105 : vector<8x1xf32> to vector<8x8xf32>
    %107 = arith.subf %103, %106 : vector<8x8xf32>
    %108 = math.exp %107 : vector<8x8xf32>
    %cst_72 = arith.constant dense<0.000000e+00> : vector<8xf32>
    %109 = vector.multi_reduction <add>, %108, %cst_72 [1] : vector<8x8xf32> to vector<8xf32>
    %110 = vector.shape_cast %109 : vector<8xf32> to vector<8x1xf32>
    %111 = vector.broadcast %110 : vector<8x1xf32> to vector<8x8xf32>
    %112 = arith.divf %108, %111 : vector<8x8xf32>
    %cst_73 = arith.constant dense<0.000000e+00> : vector<8x8xf32>
    %113 = tpu.matmul %112, %87, %cst_73 {dimension_numbers = #tpu.dot_dimension_numbers<[1], [0], [0], [1], [0, 0, 1, 1], [], []>} : vector<8x8xf32>, vector<8x8xf32>, vector<8x8xf32> -> vector<8x8xf32>
    %c0_74 = arith.constant 0 : index
    %c0_75 = arith.constant 0 : index
    %c0_76 = arith.constant 0 : index
    %114 = vector.load %arg12[%c0_74, %c0_75, %c0_76] : memref<4x8x32xf32, #tpu.memory_space<vmem>>, vector<1x8x32xf32>
    %115 = vector.shape_cast %114 : vector<1x8x32xf32> to vector<8x32xf32>
    %cst_77 = arith.constant dense<0.000000e+00> : vector<8x32xf32>
    %116 = tpu.matmul %113, %115, %cst_77 {dimension_numbers = #tpu.dot_dimension_numbers<[1], [0], [0], [1], [0, 0, 1, 1], [], []>} : vector<8x8xf32>, vector<8x32xf32>, vector<8x32xf32> -> vector<8x32xf32>
    %117 = arith.addf %70, %116 : vector<8x32xf32>
    %118 = arith.mulf %112, %55 : vector<8x8xf32>
    %cst_78 = arith.constant dense<0.000000e+00> : vector<8x8xf32>
    %119 = tpu.matmul %118, %84, %cst_78 {dimension_numbers = #tpu.dot_dimension_numbers<[1], [0], [0], [1], [0, 0, 1, 1], [], []>} : vector<8x8xf32>, vector<8x8xf32>, vector<8x8xf32> -> vector<8x8xf32>
    %c0_79 = arith.constant 0 : index
    %c0_80 = arith.constant 0 : index
    %c0_81 = arith.constant 0 : index
    %120 = vector.load %arg11[%c0_79, %c0_80, %c0_81] : memref<4x8x32xf32, #tpu.memory_space<vmem>>, vector<1x8x32xf32>
    %121 = vector.shape_cast %120 : vector<1x8x32xf32> to vector<8x32xf32>
    %cst_82 = arith.constant dense<0.000000e+00> : vector<8x32xf32>
    %122 = tpu.matmul %119, %121, %cst_82 {dimension_numbers = #tpu.dot_dimension_numbers<[1], [0], [0], [1], [0, 0, 1, 1], [], []>} : vector<8x8xf32>, vector<8x32xf32>, vector<8x32xf32> -> vector<8x32xf32>
    %123 = arith.addf %71, %122 : vector<8x32xf32>
    %124 = arith.mulf %112, %62 : vector<8x8xf32>
    %cst_83 = arith.constant dense<0.000000e+00> : vector<8x8xf32>
    %125 = tpu.matmul %124, %84, %cst_83 {dimension_numbers = #tpu.dot_dimension_numbers<[1], [0], [0], [1], [0, 0, 1, 1], [], []>} : vector<8x8xf32>, vector<8x8xf32>, vector<8x8xf32> -> vector<8x8xf32>
    %c0_84 = arith.constant 0 : index
    %c0_85 = arith.constant 0 : index
    %c0_86 = arith.constant 0 : index
    %126 = vector.load %arg11[%c0_84, %c0_85, %c0_86] : memref<4x8x32xf32, #tpu.memory_space<vmem>>, vector<1x8x32xf32>
    %127 = vector.shape_cast %126 : vector<1x8x32xf32> to vector<8x32xf32>
    %cst_87 = arith.constant dense<0.000000e+00> : vector<8x32xf32>
    %128 = tpu.matmul %125, %127, %cst_87 {dimension_numbers = #tpu.dot_dimension_numbers<[1], [0], [0], [1], [0, 0, 1, 1], [], []>} : vector<8x8xf32>, vector<8x32xf32>, vector<8x32xf32> -> vector<8x32xf32>
    %129 = arith.addf %72, %128 : vector<8x32xf32>
    %130 = arith.mulf %112, %69 : vector<8x8xf32>
    %cst_88 = arith.constant dense<0.000000e+00> : vector<8x8xf32>
    %131 = tpu.matmul %130, %84, %cst_88 {dimension_numbers = #tpu.dot_dimension_numbers<[1], [0], [0], [1], [0, 0, 1, 1], [], []>} : vector<8x8xf32>, vector<8x8xf32>, vector<8x8xf32> -> vector<8x8xf32>
    %c0_89 = arith.constant 0 : index
    %c0_90 = arith.constant 0 : index
    %c0_91 = arith.constant 0 : index
    %132 = vector.load %arg11[%c0_89, %c0_90, %c0_91] : memref<4x8x32xf32, #tpu.memory_space<vmem>>, vector<1x8x32xf32>
    %133 = vector.shape_cast %132 : vector<1x8x32xf32> to vector<8x32xf32>
    %cst_92 = arith.constant dense<0.000000e+00> : vector<8x32xf32>
    %134 = tpu.matmul %131, %133, %cst_92 {dimension_numbers = #tpu.dot_dimension_numbers<[1], [0], [0], [1], [0, 0, 1, 1], [], []>} : vector<8x8xf32>, vector<8x32xf32>, vector<8x32xf32> -> vector<8x32xf32>
    %135 = arith.addf %73, %134 : vector<8x32xf32>
    %c1_93 = arith.constant 1 : index
    %c0_94 = arith.constant 0 : index
    %c0_95 = arith.constant 0 : index
    %136 = vector.load %arg7[%c1_93, %c0_94, %c0_95] : memref<4x32x8xf32, #tpu.memory_space<vmem>>, vector<1x32x8xf32>
    %137 = vector.shape_cast %136 : vector<1x32x8xf32> to vector<32x8xf32>
    %cst_96 = arith.constant dense<0.000000e+00> : vector<8x8xf32>
    %138 = tpu.matmul %1, %137, %cst_96 {dimension_numbers = #tpu.dot_dimension_numbers<[1], [0], [0], [1], [0, 0, 1, 1], [], []>} : vector<8x32xf32>, vector<32x8xf32>, vector<8x8xf32> -> vector<8x8xf32>
    %cst_97 = arith.constant 0.353553385 : f32
    %139 = vector.broadcast %cst_97 : f32 to vector<8x8xf32>
    %140 = arith.mulf %138, %139 : vector<8x8xf32>
    %c1_98 = arith.constant 1 : index
    %c0_99 = arith.constant 0 : index
    %c0_100 = arith.constant 0 : index
    %141 = vector.load %arg8[%c1_98, %c0_99, %c0_100] : memref<4x32x8xf32, #tpu.memory_space<vmem>>, vector<1x32x8xf32>
    %142 = vector.shape_cast %141 : vector<1x32x8xf32> to vector<32x8xf32>
    %cst_101 = arith.constant dense<0.000000e+00> : vector<8x8xf32>
    %143 = tpu.matmul %1, %142, %cst_101 {dimension_numbers = #tpu.dot_dimension_numbers<[1], [0], [0], [1], [0, 0, 1, 1], [], []>} : vector<8x32xf32>, vector<32x8xf32>, vector<8x8xf32> -> vector<8x8xf32>
    %c1_102 = arith.constant 1 : index
    %c0_103 = arith.constant 0 : index
    %c0_104 = arith.constant 0 : index
    %144 = vector.load %arg9[%c1_102, %c0_103, %c0_104] : memref<4x32x8xf32, #tpu.memory_space<vmem>>, vector<1x32x8xf32>
    %145 = vector.shape_cast %144 : vector<1x32x8xf32> to vector<32x8xf32>
    %cst_105 = arith.constant dense<0.000000e+00> : vector<8x8xf32>
    %146 = tpu.matmul %1, %145, %cst_105 {dimension_numbers = #tpu.dot_dimension_numbers<[1], [0], [0], [1], [0, 0, 1, 1], [], []>} : vector<8x32xf32>, vector<32x8xf32>, vector<8x8xf32> -> vector<8x8xf32>
    %c1_106 = arith.constant 1 : index
    %c0_107 = arith.constant 0 : index
    %c0_108 = arith.constant 0 : index
    %147 = vector.load %arg10[%c1_106, %c0_107, %c0_108] : memref<4x32x8xf32, #tpu.memory_space<vmem>>, vector<1x32x8xf32>
    %148 = vector.shape_cast %147 : vector<1x32x8xf32> to vector<32x8xf32>
    %cst_109 = arith.constant dense<0.000000e+00> : vector<8x8xf32>
    %149 = tpu.matmul %1, %148, %cst_109 {dimension_numbers = #tpu.dot_dimension_numbers<[1], [0], [0], [1], [0, 0, 1, 1], [], []>} : vector<8x32xf32>, vector<32x8xf32>, vector<8x8xf32> -> vector<8x8xf32>
    %cst_110 = arith.constant dense<0.000000e+00> : vector<8x8xf32>
    %150 = tpu.matmul %140, %143, %cst_110 {dimension_numbers = #tpu.dot_dimension_numbers<[1], [1], [0], [0], [0, 0, 1, 0], [], []>} : vector<8x8xf32>, vector<8x8xf32>, vector<8x8xf32> -> vector<8x8xf32>
    %c0_111 = arith.constant 0 : index
    %c1_112 = arith.constant 1 : index
    %c0_113 = arith.constant 0 : index
    %c0_114 = arith.constant 0 : index
    %151 = vector.load %arg4[%c0_111, %c1_112, %c0_113, %c0_114] : memref<1x4x8x8xf32, #tpu.memory_space<vmem>>, vector<1x1x8x8xf32>
    %152 = vector.shape_cast %151 : vector<1x1x8x8xf32> to vector<8x8xf32>
    %153 = arith.addf %150, %152 : vector<8x8xf32>
    %cst_115 = arith.constant 5.000000e-01 : f32
    %154 = vector.broadcast %cst_115 : f32 to vector<1x8xf32>
    %155 = arith.cmpf ogt, %5, %154 : vector<1x8xf32>
    %cst_116 = arith.constant -3.40282347E+38 : f32
    %156 = vector.shape_cast %155 : vector<1x8xi1> to vector<1x8xi1>
    %157 = vector.broadcast %156 : vector<1x8xi1> to vector<8x8xi1>
    %158 = vector.broadcast %cst_116 : f32 to vector<8x8xf32>
    %159 = arith.select %157, %158, %153 : vector<8x8xi1>, vector<8x8xf32>
    %cst_117 = arith.constant 5.000000e-01 : f32
    %160 = vector.broadcast %cst_117 : f32 to vector<8x1xf32>
    %161 = arith.cmpf ogt, %3, %160 : vector<8x1xf32>
    %cst_118 = arith.constant -3.40282347E+38 : f32
    %162 = vector.shape_cast %161 : vector<8x1xi1> to vector<8x1xi1>
    %163 = vector.broadcast %162 : vector<8x1xi1> to vector<8x8xi1>
    %164 = vector.broadcast %cst_118 : f32 to vector<8x8xf32>
    %165 = arith.select %163, %164, %159 : vector<8x8xi1>, vector<8x8xf32>
    %cst_119 = arith.constant dense<0xFF800000> : vector<8xf32>
    %166 = vector.multi_reduction <maximumf>, %165, %cst_119 [1] : vector<8x8xf32> to vector<8xf32>
    %167 = vector.shape_cast %166 : vector<8xf32> to vector<8x1xf32>
    %168 = vector.broadcast %167 : vector<8x1xf32> to vector<8x8xf32>
    %169 = arith.subf %165, %168 : vector<8x8xf32>
    %170 = math.exp %169 : vector<8x8xf32>
    %cst_120 = arith.constant dense<0.000000e+00> : vector<8xf32>
    %171 = vector.multi_reduction <add>, %170, %cst_120 [1] : vector<8x8xf32> to vector<8xf32>
    %172 = vector.shape_cast %171 : vector<8xf32> to vector<8x1xf32>
    %173 = vector.broadcast %172 : vector<8x1xf32> to vector<8x8xf32>
    %174 = arith.divf %170, %173 : vector<8x8xf32>
    %cst_121 = arith.constant dense<0.000000e+00> : vector<8x8xf32>
    %175 = tpu.matmul %174, %149, %cst_121 {dimension_numbers = #tpu.dot_dimension_numbers<[1], [0], [0], [1], [0, 0, 1, 1], [], []>} : vector<8x8xf32>, vector<8x8xf32>, vector<8x8xf32> -> vector<8x8xf32>
    %c1_122 = arith.constant 1 : index
    %c0_123 = arith.constant 0 : index
    %c0_124 = arith.constant 0 : index
    %176 = vector.load %arg12[%c1_122, %c0_123, %c0_124] : memref<4x8x32xf32, #tpu.memory_space<vmem>>, vector<1x8x32xf32>
    %177 = vector.shape_cast %176 : vector<1x8x32xf32> to vector<8x32xf32>
    %cst_125 = arith.constant dense<0.000000e+00> : vector<8x32xf32>
    %178 = tpu.matmul %175, %177, %cst_125 {dimension_numbers = #tpu.dot_dimension_numbers<[1], [0], [0], [1], [0, 0, 1, 1], [], []>} : vector<8x8xf32>, vector<8x32xf32>, vector<8x32xf32> -> vector<8x32xf32>
    %179 = arith.addf %117, %178 : vector<8x32xf32>
    %180 = arith.mulf %174, %55 : vector<8x8xf32>
    %cst_126 = arith.constant dense<0.000000e+00> : vector<8x8xf32>
    %181 = tpu.matmul %180, %146, %cst_126 {dimension_numbers = #tpu.dot_dimension_numbers<[1], [0], [0], [1], [0, 0, 1, 1], [], []>} : vector<8x8xf32>, vector<8x8xf32>, vector<8x8xf32> -> vector<8x8xf32>
    %c1_127 = arith.constant 1 : index
    %c0_128 = arith.constant 0 : index
    %c0_129 = arith.constant 0 : index
    %182 = vector.load %arg11[%c1_127, %c0_128, %c0_129] : memref<4x8x32xf32, #tpu.memory_space<vmem>>, vector<1x8x32xf32>
    %183 = vector.shape_cast %182 : vector<1x8x32xf32> to vector<8x32xf32>
    %cst_130 = arith.constant dense<0.000000e+00> : vector<8x32xf32>
    %184 = tpu.matmul %181, %183, %cst_130 {dimension_numbers = #tpu.dot_dimension_numbers<[1], [0], [0], [1], [0, 0, 1, 1], [], []>} : vector<8x8xf32>, vector<8x32xf32>, vector<8x32xf32> -> vector<8x32xf32>
    %185 = arith.addf %123, %184 : vector<8x32xf32>
    %186 = arith.mulf %174, %62 : vector<8x8xf32>
    %cst_131 = arith.constant dense<0.000000e+00> : vector<8x8xf32>
    %187 = tpu.matmul %186, %146, %cst_131 {dimension_numbers = #tpu.dot_dimension_numbers<[1], [0], [0], [1], [0, 0, 1, 1], [], []>} : vector<8x8xf32>, vector<8x8xf32>, vector<8x8xf32> -> vector<8x8xf32>
    %c1_132 = arith.constant 1 : index
    %c0_133 = arith.constant 0 : index
    %c0_134 = arith.constant 0 : index
    %188 = vector.load %arg11[%c1_132, %c0_133, %c0_134] : memref<4x8x32xf32, #tpu.memory_space<vmem>>, vector<1x8x32xf32>
    %189 = vector.shape_cast %188 : vector<1x8x32xf32> to vector<8x32xf32>
    %cst_135 = arith.constant dense<0.000000e+00> : vector<8x32xf32>
    %190 = tpu.matmul %187, %189, %cst_135 {dimension_numbers = #tpu.dot_dimension_numbers<[1], [0], [0], [1], [0, 0, 1, 1], [], []>} : vector<8x8xf32>, vector<8x32xf32>, vector<8x32xf32> -> vector<8x32xf32>
    %191 = arith.addf %129, %190 : vector<8x32xf32>
    %192 = arith.mulf %174, %69 : vector<8x8xf32>
    %cst_136 = arith.constant dense<0.000000e+00> : vector<8x8xf32>
    %193 = tpu.matmul %192, %146, %cst_136 {dimension_numbers = #tpu.dot_dimension_numbers<[1], [0], [0], [1], [0, 0, 1, 1], [], []>} : vector<8x8xf32>, vector<8x8xf32>, vector<8x8xf32> -> vector<8x8xf32>
    %c1_137 = arith.constant 1 : index
    %c0_138 = arith.constant 0 : index
    %c0_139 = arith.constant 0 : index
    %194 = vector.load %arg11[%c1_137, %c0_138, %c0_139] : memref<4x8x32xf32, #tpu.memory_space<vmem>>, vector<1x8x32xf32>
    %195 = vector.shape_cast %194 : vector<1x8x32xf32> to vector<8x32xf32>
    %cst_140 = arith.constant dense<0.000000e+00> : vector<8x32xf32>
    %196 = tpu.matmul %193, %195, %cst_140 {dimension_numbers = #tpu.dot_dimension_numbers<[1], [0], [0], [1], [0, 0, 1, 1], [], []>} : vector<8x8xf32>, vector<8x32xf32>, vector<8x32xf32> -> vector<8x32xf32>
    %197 = arith.addf %135, %196 : vector<8x32xf32>
    %c2_141 = arith.constant 2 : index
    %c0_142 = arith.constant 0 : index
    %c0_143 = arith.constant 0 : index
    %198 = vector.load %arg7[%c2_141, %c0_142, %c0_143] : memref<4x32x8xf32, #tpu.memory_space<vmem>>, vector<1x32x8xf32>
    %199 = vector.shape_cast %198 : vector<1x32x8xf32> to vector<32x8xf32>
    %cst_144 = arith.constant dense<0.000000e+00> : vector<8x8xf32>
    %200 = tpu.matmul %1, %199, %cst_144 {dimension_numbers = #tpu.dot_dimension_numbers<[1], [0], [0], [1], [0, 0, 1, 1], [], []>} : vector<8x32xf32>, vector<32x8xf32>, vector<8x8xf32> -> vector<8x8xf32>
    %cst_145 = arith.constant 0.353553385 : f32
    %201 = vector.broadcast %cst_145 : f32 to vector<8x8xf32>
    %202 = arith.mulf %200, %201 : vector<8x8xf32>
    %c2_146 = arith.constant 2 : index
    %c0_147 = arith.constant 0 : index
    %c0_148 = arith.constant 0 : index
    %203 = vector.load %arg8[%c2_146, %c0_147, %c0_148] : memref<4x32x8xf32, #tpu.memory_space<vmem>>, vector<1x32x8xf32>
    %204 = vector.shape_cast %203 : vector<1x32x8xf32> to vector<32x8xf32>
    %cst_149 = arith.constant dense<0.000000e+00> : vector<8x8xf32>
    %205 = tpu.matmul %1, %204, %cst_149 {dimension_numbers = #tpu.dot_dimension_numbers<[1], [0], [0], [1], [0, 0, 1, 1], [], []>} : vector<8x32xf32>, vector<32x8xf32>, vector<8x8xf32> -> vector<8x8xf32>
    %c2_150 = arith.constant 2 : index
    %c0_151 = arith.constant 0 : index
    %c0_152 = arith.constant 0 : index
    %206 = vector.load %arg9[%c2_150, %c0_151, %c0_152] : memref<4x32x8xf32, #tpu.memory_space<vmem>>, vector<1x32x8xf32>
    %207 = vector.shape_cast %206 : vector<1x32x8xf32> to vector<32x8xf32>
    %cst_153 = arith.constant dense<0.000000e+00> : vector<8x8xf32>
    %208 = tpu.matmul %1, %207, %cst_153 {dimension_numbers = #tpu.dot_dimension_numbers<[1], [0], [0], [1], [0, 0, 1, 1], [], []>} : vector<8x32xf32>, vector<32x8xf32>, vector<8x8xf32> -> vector<8x8xf32>
    %c2_154 = arith.constant 2 : index
    %c0_155 = arith.constant 0 : index
    %c0_156 = arith.constant 0 : index
    %209 = vector.load %arg10[%c2_154, %c0_155, %c0_156] : memref<4x32x8xf32, #tpu.memory_space<vmem>>, vector<1x32x8xf32>
    %210 = vector.shape_cast %209 : vector<1x32x8xf32> to vector<32x8xf32>
    %cst_157 = arith.constant dense<0.000000e+00> : vector<8x8xf32>
    %211 = tpu.matmul %1, %210, %cst_157 {dimension_numbers = #tpu.dot_dimension_numbers<[1], [0], [0], [1], [0, 0, 1, 1], [], []>} : vector<8x32xf32>, vector<32x8xf32>, vector<8x8xf32> -> vector<8x8xf32>
    %cst_158 = arith.constant dense<0.000000e+00> : vector<8x8xf32>
    %212 = tpu.matmul %202, %205, %cst_158 {dimension_numbers = #tpu.dot_dimension_numbers<[1], [1], [0], [0], [0, 0, 1, 0], [], []>} : vector<8x8xf32>, vector<8x8xf32>, vector<8x8xf32> -> vector<8x8xf32>
    %c0_159 = arith.constant 0 : index
    %c2_160 = arith.constant 2 : index
    %c0_161 = arith.constant 0 : index
    %c0_162 = arith.constant 0 : index
    %213 = vector.load %arg4[%c0_159, %c2_160, %c0_161, %c0_162] : memref<1x4x8x8xf32, #tpu.memory_space<vmem>>, vector<1x1x8x8xf32>
    %214 = vector.shape_cast %213 : vector<1x1x8x8xf32> to vector<8x8xf32>
    %215 = arith.addf %212, %214 : vector<8x8xf32>
    %cst_163 = arith.constant 5.000000e-01 : f32
    %216 = vector.broadcast %cst_163 : f32 to vector<1x8xf32>
    %217 = arith.cmpf ogt, %5, %216 : vector<1x8xf32>
    %cst_164 = arith.constant -3.40282347E+38 : f32
    %218 = vector.shape_cast %217 : vector<1x8xi1> to vector<1x8xi1>
    %219 = vector.broadcast %218 : vector<1x8xi1> to vector<8x8xi1>
    %220 = vector.broadcast %cst_164 : f32 to vector<8x8xf32>
    %221 = arith.select %219, %220, %215 : vector<8x8xi1>, vector<8x8xf32>
    %cst_165 = arith.constant 5.000000e-01 : f32
    %222 = vector.broadcast %cst_165 : f32 to vector<8x1xf32>
    %223 = arith.cmpf ogt, %3, %222 : vector<8x1xf32>
    %cst_166 = arith.constant -3.40282347E+38 : f32
    %224 = vector.shape_cast %223 : vector<8x1xi1> to vector<8x1xi1>
    %225 = vector.broadcast %224 : vector<8x1xi1> to vector<8x8xi1>
    %226 = vector.broadcast %cst_166 : f32 to vector<8x8xf32>
    %227 = arith.select %225, %226, %221 : vector<8x8xi1>, vector<8x8xf32>
    %cst_167 = arith.constant dense<0xFF800000> : vector<8xf32>
    %228 = vector.multi_reduction <maximumf>, %227, %cst_167 [1] : vector<8x8xf32> to vector<8xf32>
    %229 = vector.shape_cast %228 : vector<8xf32> to vector<8x1xf32>
    %230 = vector.broadcast %229 : vector<8x1xf32> to vector<8x8xf32>
    %231 = arith.subf %227, %230 : vector<8x8xf32>
    %232 = math.exp %231 : vector<8x8xf32>
    %cst_168 = arith.constant dense<0.000000e+00> : vector<8xf32>
    %233 = vector.multi_reduction <add>, %232, %cst_168 [1] : vector<8x8xf32> to vector<8xf32>
    %234 = vector.shape_cast %233 : vector<8xf32> to vector<8x1xf32>
    %235 = vector.broadcast %234 : vector<8x1xf32> to vector<8x8xf32>
    %236 = arith.divf %232, %235 : vector<8x8xf32>
    %cst_169 = arith.constant dense<0.000000e+00> : vector<8x8xf32>
    %237 = tpu.matmul %236, %211, %cst_169 {dimension_numbers = #tpu.dot_dimension_numbers<[1], [0], [0], [1], [0, 0, 1, 1], [], []>} : vector<8x8xf32>, vector<8x8xf32>, vector<8x8xf32> -> vector<8x8xf32>
    %c2_170 = arith.constant 2 : index
    %c0_171 = arith.constant 0 : index
    %c0_172 = arith.constant 0 : index
    %238 = vector.load %arg12[%c2_170, %c0_171, %c0_172] : memref<4x8x32xf32, #tpu.memory_space<vmem>>, vector<1x8x32xf32>
    %239 = vector.shape_cast %238 : vector<1x8x32xf32> to vector<8x32xf32>
    %cst_173 = arith.constant dense<0.000000e+00> : vector<8x32xf32>
    %240 = tpu.matmul %237, %239, %cst_173 {dimension_numbers = #tpu.dot_dimension_numbers<[1], [0], [0], [1], [0, 0, 1, 1], [], []>} : vector<8x8xf32>, vector<8x32xf32>, vector<8x32xf32> -> vector<8x32xf32>
    %241 = arith.addf %179, %240 : vector<8x32xf32>
    %242 = arith.mulf %236, %55 : vector<8x8xf32>
    %cst_174 = arith.constant dense<0.000000e+00> : vector<8x8xf32>
    %243 = tpu.matmul %242, %208, %cst_174 {dimension_numbers = #tpu.dot_dimension_numbers<[1], [0], [0], [1], [0, 0, 1, 1], [], []>} : vector<8x8xf32>, vector<8x8xf32>, vector<8x8xf32> -> vector<8x8xf32>
    %c2_175 = arith.constant 2 : index
    %c0_176 = arith.constant 0 : index
    %c0_177 = arith.constant 0 : index
    %244 = vector.load %arg11[%c2_175, %c0_176, %c0_177] : memref<4x8x32xf32, #tpu.memory_space<vmem>>, vector<1x8x32xf32>
    %245 = vector.shape_cast %244 : vector<1x8x32xf32> to vector<8x32xf32>
    %cst_178 = arith.constant dense<0.000000e+00> : vector<8x32xf32>
    %246 = tpu.matmul %243, %245, %cst_178 {dimension_numbers = #tpu.dot_dimension_numbers<[1], [0], [0], [1], [0, 0, 1, 1], [], []>} : vector<8x8xf32>, vector<8x32xf32>, vector<8x32xf32> -> vector<8x32xf32>
    %247 = arith.addf %185, %246 : vector<8x32xf32>
    %248 = arith.mulf %236, %62 : vector<8x8xf32>
    %cst_179 = arith.constant dense<0.000000e+00> : vector<8x8xf32>
    %249 = tpu.matmul %248, %208, %cst_179 {dimension_numbers = #tpu.dot_dimension_numbers<[1], [0], [0], [1], [0, 0, 1, 1], [], []>} : vector<8x8xf32>, vector<8x8xf32>, vector<8x8xf32> -> vector<8x8xf32>
    %c2_180 = arith.constant 2 : index
    %c0_181 = arith.constant 0 : index
    %c0_182 = arith.constant 0 : index
    %250 = vector.load %arg11[%c2_180, %c0_181, %c0_182] : memref<4x8x32xf32, #tpu.memory_space<vmem>>, vector<1x8x32xf32>
    %251 = vector.shape_cast %250 : vector<1x8x32xf32> to vector<8x32xf32>
    %cst_183 = arith.constant dense<0.000000e+00> : vector<8x32xf32>
    %252 = tpu.matmul %249, %251, %cst_183 {dimension_numbers = #tpu.dot_dimension_numbers<[1], [0], [0], [1], [0, 0, 1, 1], [], []>} : vector<8x8xf32>, vector<8x32xf32>, vector<8x32xf32> -> vector<8x32xf32>
    %253 = arith.addf %191, %252 : vector<8x32xf32>
    %254 = arith.mulf %236, %69 : vector<8x8xf32>
    %cst_184 = arith.constant dense<0.000000e+00> : vector<8x8xf32>
    %255 = tpu.matmul %254, %208, %cst_184 {dimension_numbers = #tpu.dot_dimension_numbers<[1], [0], [0], [1], [0, 0, 1, 1], [], []>} : vector<8x8xf32>, vector<8x8xf32>, vector<8x8xf32> -> vector<8x8xf32>
    %c2_185 = arith.constant 2 : index
    %c0_186 = arith.constant 0 : index
    %c0_187 = arith.constant 0 : index
    %256 = vector.load %arg11[%c2_185, %c0_186, %c0_187] : memref<4x8x32xf32, #tpu.memory_space<vmem>>, vector<1x8x32xf32>
    %257 = vector.shape_cast %256 : vector<1x8x32xf32> to vector<8x32xf32>
    %cst_188 = arith.constant dense<0.000000e+00> : vector<8x32xf32>
    %258 = tpu.matmul %255, %257, %cst_188 {dimension_numbers = #tpu.dot_dimension_numbers<[1], [0], [0], [1], [0, 0, 1, 1], [], []>} : vector<8x8xf32>, vector<8x32xf32>, vector<8x32xf32> -> vector<8x32xf32>
    %259 = arith.addf %197, %258 : vector<8x32xf32>
    %c3 = arith.constant 3 : index
    %c0_189 = arith.constant 0 : index
    %c0_190 = arith.constant 0 : index
    %260 = vector.load %arg7[%c3, %c0_189, %c0_190] : memref<4x32x8xf32, #tpu.memory_space<vmem>>, vector<1x32x8xf32>
    %261 = vector.shape_cast %260 : vector<1x32x8xf32> to vector<32x8xf32>
    %cst_191 = arith.constant dense<0.000000e+00> : vector<8x8xf32>
    %262 = tpu.matmul %1, %261, %cst_191 {dimension_numbers = #tpu.dot_dimension_numbers<[1], [0], [0], [1], [0, 0, 1, 1], [], []>} : vector<8x32xf32>, vector<32x8xf32>, vector<8x8xf32> -> vector<8x8xf32>
    %cst_192 = arith.constant 0.353553385 : f32
    %263 = vector.broadcast %cst_192 : f32 to vector<8x8xf32>
    %264 = arith.mulf %262, %263 : vector<8x8xf32>
    %c3_193 = arith.constant 3 : index
    %c0_194 = arith.constant 0 : index
    %c0_195 = arith.constant 0 : index
    %265 = vector.load %arg8[%c3_193, %c0_194, %c0_195] : memref<4x32x8xf32, #tpu.memory_space<vmem>>, vector<1x32x8xf32>
    %266 = vector.shape_cast %265 : vector<1x32x8xf32> to vector<32x8xf32>
    %cst_196 = arith.constant dense<0.000000e+00> : vector<8x8xf32>
    %267 = tpu.matmul %1, %266, %cst_196 {dimension_numbers = #tpu.dot_dimension_numbers<[1], [0], [0], [1], [0, 0, 1, 1], [], []>} : vector<8x32xf32>, vector<32x8xf32>, vector<8x8xf32> -> vector<8x8xf32>
    %c3_197 = arith.constant 3 : index
    %c0_198 = arith.constant 0 : index
    %c0_199 = arith.constant 0 : index
    %268 = vector.load %arg9[%c3_197, %c0_198, %c0_199] : memref<4x32x8xf32, #tpu.memory_space<vmem>>, vector<1x32x8xf32>
    %269 = vector.shape_cast %268 : vector<1x32x8xf32> to vector<32x8xf32>
    %cst_200 = arith.constant dense<0.000000e+00> : vector<8x8xf32>
    %270 = tpu.matmul %1, %269, %cst_200 {dimension_numbers = #tpu.dot_dimension_numbers<[1], [0], [0], [1], [0, 0, 1, 1], [], []>} : vector<8x32xf32>, vector<32x8xf32>, vector<8x8xf32> -> vector<8x8xf32>
    %c3_201 = arith.constant 3 : index
    %c0_202 = arith.constant 0 : index
    %c0_203 = arith.constant 0 : index
    %271 = vector.load %arg10[%c3_201, %c0_202, %c0_203] : memref<4x32x8xf32, #tpu.memory_space<vmem>>, vector<1x32x8xf32>
    %272 = vector.shape_cast %271 : vector<1x32x8xf32> to vector<32x8xf32>
    %cst_204 = arith.constant dense<0.000000e+00> : vector<8x8xf32>
    %273 = tpu.matmul %1, %272, %cst_204 {dimension_numbers = #tpu.dot_dimension_numbers<[1], [0], [0], [1], [0, 0, 1, 1], [], []>} : vector<8x32xf32>, vector<32x8xf32>, vector<8x8xf32> -> vector<8x8xf32>
    %cst_205 = arith.constant dense<0.000000e+00> : vector<8x8xf32>
    %274 = tpu.matmul %264, %267, %cst_205 {dimension_numbers = #tpu.dot_dimension_numbers<[1], [1], [0], [0], [0, 0, 1, 0], [], []>} : vector<8x8xf32>, vector<8x8xf32>, vector<8x8xf32> -> vector<8x8xf32>
    %c0_206 = arith.constant 0 : index
    %c3_207 = arith.constant 3 : index
    %c0_208 = arith.constant 0 : index
    %c0_209 = arith.constant 0 : index
    %275 = vector.load %arg4[%c0_206, %c3_207, %c0_208, %c0_209] : memref<1x4x8x8xf32, #tpu.memory_space<vmem>>, vector<1x1x8x8xf32>
    %276 = vector.shape_cast %275 : vector<1x1x8x8xf32> to vector<8x8xf32>
    %277 = arith.addf %274, %276 : vector<8x8xf32>
    %cst_210 = arith.constant 5.000000e-01 : f32
    %278 = vector.broadcast %cst_210 : f32 to vector<1x8xf32>
    %279 = arith.cmpf ogt, %5, %278 : vector<1x8xf32>
    %cst_211 = arith.constant -3.40282347E+38 : f32
    %280 = vector.shape_cast %279 : vector<1x8xi1> to vector<1x8xi1>
    %281 = vector.broadcast %280 : vector<1x8xi1> to vector<8x8xi1>
    %282 = vector.broadcast %cst_211 : f32 to vector<8x8xf32>
    %283 = arith.select %281, %282, %277 : vector<8x8xi1>, vector<8x8xf32>
    %cst_212 = arith.constant 5.000000e-01 : f32
    %284 = vector.broadcast %cst_212 : f32 to vector<8x1xf32>
    %285 = arith.cmpf ogt, %3, %284 : vector<8x1xf32>
    %cst_213 = arith.constant -3.40282347E+38 : f32
    %286 = vector.shape_cast %285 : vector<8x1xi1> to vector<8x1xi1>
    %287 = vector.broadcast %286 : vector<8x1xi1> to vector<8x8xi1>
    %288 = vector.broadcast %cst_213 : f32 to vector<8x8xf32>
    %289 = arith.select %287, %288, %283 : vector<8x8xi1>, vector<8x8xf32>
    %cst_214 = arith.constant dense<0xFF800000> : vector<8xf32>
    %290 = vector.multi_reduction <maximumf>, %289, %cst_214 [1] : vector<8x8xf32> to vector<8xf32>
    %291 = vector.shape_cast %290 : vector<8xf32> to vector<8x1xf32>
    %292 = vector.broadcast %291 : vector<8x1xf32> to vector<8x8xf32>
    %293 = arith.subf %289, %292 : vector<8x8xf32>
    %294 = math.exp %293 : vector<8x8xf32>
    %cst_215 = arith.constant dense<0.000000e+00> : vector<8xf32>
    %295 = vector.multi_reduction <add>, %294, %cst_215 [1] : vector<8x8xf32> to vector<8xf32>
    %296 = vector.shape_cast %295 : vector<8xf32> to vector<8x1xf32>
    %297 = vector.broadcast %296 : vector<8x1xf32> to vector<8x8xf32>
    %298 = arith.divf %294, %297 : vector<8x8xf32>
    %cst_216 = arith.constant dense<0.000000e+00> : vector<8x8xf32>
    %299 = tpu.matmul %298, %273, %cst_216 {dimension_numbers = #tpu.dot_dimension_numbers<[1], [0], [0], [1], [0, 0, 1, 1], [], []>} : vector<8x8xf32>, vector<8x8xf32>, vector<8x8xf32> -> vector<8x8xf32>
    %c3_217 = arith.constant 3 : index
    %c0_218 = arith.constant 0 : index
    %c0_219 = arith.constant 0 : index
    %300 = vector.load %arg12[%c3_217, %c0_218, %c0_219] : memref<4x8x32xf32, #tpu.memory_space<vmem>>, vector<1x8x32xf32>
    %301 = vector.shape_cast %300 : vector<1x8x32xf32> to vector<8x32xf32>
    %cst_220 = arith.constant dense<0.000000e+00> : vector<8x32xf32>
    %302 = tpu.matmul %299, %301, %cst_220 {dimension_numbers = #tpu.dot_dimension_numbers<[1], [0], [0], [1], [0, 0, 1, 1], [], []>} : vector<8x8xf32>, vector<8x32xf32>, vector<8x32xf32> -> vector<8x32xf32>
    %303 = arith.addf %241, %302 : vector<8x32xf32>
    %304 = arith.mulf %298, %55 : vector<8x8xf32>
    %cst_221 = arith.constant dense<0.000000e+00> : vector<8x8xf32>
    %305 = tpu.matmul %304, %270, %cst_221 {dimension_numbers = #tpu.dot_dimension_numbers<[1], [0], [0], [1], [0, 0, 1, 1], [], []>} : vector<8x8xf32>, vector<8x8xf32>, vector<8x8xf32> -> vector<8x8xf32>
    %c3_222 = arith.constant 3 : index
    %c0_223 = arith.constant 0 : index
    %c0_224 = arith.constant 0 : index
    %306 = vector.load %arg11[%c3_222, %c0_223, %c0_224] : memref<4x8x32xf32, #tpu.memory_space<vmem>>, vector<1x8x32xf32>
    %307 = vector.shape_cast %306 : vector<1x8x32xf32> to vector<8x32xf32>
    %cst_225 = arith.constant dense<0.000000e+00> : vector<8x32xf32>
    %308 = tpu.matmul %305, %307, %cst_225 {dimension_numbers = #tpu.dot_dimension_numbers<[1], [0], [0], [1], [0, 0, 1, 1], [], []>} : vector<8x8xf32>, vector<8x32xf32>, vector<8x32xf32> -> vector<8x32xf32>
    %309 = arith.addf %247, %308 : vector<8x32xf32>
    %310 = arith.mulf %298, %62 : vector<8x8xf32>
    %cst_226 = arith.constant dense<0.000000e+00> : vector<8x8xf32>
    %311 = tpu.matmul %310, %270, %cst_226 {dimension_numbers = #tpu.dot_dimension_numbers<[1], [0], [0], [1], [0, 0, 1, 1], [], []>} : vector<8x8xf32>, vector<8x8xf32>, vector<8x8xf32> -> vector<8x8xf32>
    %c3_227 = arith.constant 3 : index
    %c0_228 = arith.constant 0 : index
    %c0_229 = arith.constant 0 : index
    %312 = vector.load %arg11[%c3_227, %c0_228, %c0_229] : memref<4x8x32xf32, #tpu.memory_space<vmem>>, vector<1x8x32xf32>
    %313 = vector.shape_cast %312 : vector<1x8x32xf32> to vector<8x32xf32>
    %cst_230 = arith.constant dense<0.000000e+00> : vector<8x32xf32>
    %314 = tpu.matmul %311, %313, %cst_230 {dimension_numbers = #tpu.dot_dimension_numbers<[1], [0], [0], [1], [0, 0, 1, 1], [], []>} : vector<8x8xf32>, vector<8x32xf32>, vector<8x32xf32> -> vector<8x32xf32>
    %315 = arith.addf %253, %314 : vector<8x32xf32>
    %316 = arith.mulf %298, %69 : vector<8x8xf32>
    %cst_231 = arith.constant dense<0.000000e+00> : vector<8x8xf32>
    %317 = tpu.matmul %316, %270, %cst_231 {dimension_numbers = #tpu.dot_dimension_numbers<[1], [0], [0], [1], [0, 0, 1, 1], [], []>} : vector<8x8xf32>, vector<8x8xf32>, vector<8x8xf32> -> vector<8x8xf32>
    %c3_232 = arith.constant 3 : index
    %c0_233 = arith.constant 0 : index
    %c0_234 = arith.constant 0 : index
    %318 = vector.load %arg11[%c3_232, %c0_233, %c0_234] : memref<4x8x32xf32, #tpu.memory_space<vmem>>, vector<1x8x32xf32>
    %319 = vector.shape_cast %318 : vector<1x8x32xf32> to vector<8x32xf32>
    %cst_235 = arith.constant dense<0.000000e+00> : vector<8x32xf32>
    %320 = tpu.matmul %317, %319, %cst_235 {dimension_numbers = #tpu.dot_dimension_numbers<[1], [0], [0], [1], [0, 0, 1, 1], [], []>} : vector<8x8xf32>, vector<8x32xf32>, vector<8x32xf32> -> vector<8x32xf32>
    %321 = arith.addf %259, %320 : vector<8x32xf32>
    %c0_236 = arith.constant 0 : index
    %c0_237 = arith.constant 0 : index
    %c0_238 = arith.constant 0 : index
    %322 = vector.load %arg13[%c0_236, %c0_237, %c0_238] : memref<1x8x32xf32, #tpu.memory_space<vmem>>, vector<1x8x32xf32>
    %323 = vector.shape_cast %322 : vector<1x8x32xf32> to vector<8x32xf32>
    %324 = vector.shape_cast %303 : vector<8x32xf32> to vector<1x8x32xf32>
    tpu.vector_store %arg13[%c0_236, %c0_237, %c0_238], %324 {strides = array<i32>} : memref<1x8x32xf32, #tpu.memory_space<vmem>>, vector<1x8x32xf32>,
    %c0_239 = arith.constant 0 : index
    %c0_240 = arith.constant 0 : index
    %c0_241 = arith.constant 0 : index
    %c0_242 = arith.constant 0 : index
    %325 = vector.load %arg14[%c0_239, %c0_240, %c0_241, %c0_242] : memref<1x3x8x32xf32, #tpu.memory_space<vmem>>, vector<1x1x8x32xf32>
    %326 = vector.shape_cast %325 : vector<1x1x8x32xf32> to vector<8x32xf32>
    %327 = vector.shape_cast %309 : vector<8x32xf32> to vector<1x1x8x32xf32>
    tpu.vector_store %arg14[%c0_239, %c0_240, %c0_241, %c0_242], %327 {strides = array<i32>} : memref<1x3x8x32xf32, #tpu.memory_space<vmem>>, vector<1x1x8x32xf32>,
    %c0_243 = arith.constant 0 : index
    %c1_244 = arith.constant 1 : index
    %c0_245 = arith.constant 0 : index
    %c0_246 = arith.constant 0 : index
    %328 = vector.load %arg14[%c0_243, %c1_244, %c0_245, %c0_246] : memref<1x3x8x32xf32, #tpu.memory_space<vmem>>, vector<1x1x8x32xf32>
    %329 = vector.shape_cast %328 : vector<1x1x8x32xf32> to vector<8x32xf32>
    %330 = vector.shape_cast %315 : vector<8x32xf32> to vector<1x1x8x32xf32>
    tpu.vector_store %arg14[%c0_243, %c1_244, %c0_245, %c0_246], %330 {strides = array<i32>} : memref<1x3x8x32xf32, #tpu.memory_space<vmem>>, vector<1x1x8x32xf32>,
    %c0_247 = arith.constant 0 : index
    %c2_248 = arith.constant 2 : index
    %c0_249 = arith.constant 0 : index
    %c0_250 = arith.constant 0 : index
    %331 = vector.load %arg14[%c0_247, %c2_248, %c0_249, %c0_250] : memref<1x3x8x32xf32, #tpu.memory_space<vmem>>, vector<1x1x8x32xf32>
    %332 = vector.shape_cast %331 : vector<1x1x8x32xf32> to vector<8x32xf32>
    %333 = vector.shape_cast %321 : vector<8x32xf32> to vector<1x1x8x32xf32>
    tpu.vector_store %arg14[%c0_247, %c2_248, %c0_249, %c0_250], %333 {strides = array<i32>} : memref<1x3x8x32xf32, #tpu.memory_space<vmem>>, vector<1x1x8x32xf32>,
    return
  }
  func.func @transform_0(%arg0: i32) -> (i32, i32, i32) {
    %c0_i32 = arith.constant 0 : i32
    %c0_i32_0 = arith.constant 0 : i32
    %c0_i32_1 = arith.constant 0 : i32
    return %arg0, %c0_i32, %c0_i32_0 : i32, i32, i32
  }
  func.func @transform_1(%arg0: i32) -> (i32, i32, i32, i32) {
    %c0_i32 = arith.constant 0 : i32
    %c0_i32_0 = arith.constant 0 : i32
    %c0_i32_1 = arith.constant 0 : i32
    %c0_i32_2 = arith.constant 0 : i32
    return %arg0, %c0_i32, %c0_i32_0, %c0_i32_1 : i32, i32, i32, i32
  }
  func.func @transform_2(%arg0: i32) -> (i32, i32, i32, i32) {
    %c0_i32 = arith.constant 0 : i32
    %c0_i32_0 = arith.constant 0 : i32
    %c0_i32_1 = arith.constant 0 : i32
    %c0_i32_2 = arith.constant 0 : i32
    return %arg0, %c0_i32, %c0_i32_0, %c0_i32_1 : i32, i32, i32, i32
  }
  func.func @transform_3(%arg0: i32) -> (i32, i32, i32, i32) {
    %c0_i32 = arith.constant 0 : i32
    %c0_i32_0 = arith.constant 0 : i32
    %c0_i32_1 = arith.constant 0 : i32
    %c0_i32_2 = arith.constant 0 : i32
    return %arg0, %c0_i32, %c0_i32_0, %c0_i32_1 : i32, i32, i32, i32
  }
  func.func @transform_4(%arg0: i32) -> (i32, i32, i32) {
    %c0_i32 = arith.constant 0 : i32
    %c0_i32_0 = arith.constant 0 : i32
    %c0_i32_1 = arith.constant 0 : i32
    return %arg0, %c0_i32, %c0_i32_0 : i32, i32, i32
  }
  func.func @transform_5(%arg0: i32) -> (i32, i32, i32) {
    %c0_i32 = arith.constant 0 : i32
    %c0_i32_0 = arith.constant 0 : i32
    %c0_i32_1 = arith.constant 0 : i32
    return %arg0, %c0_i32, %c0_i32_0 : i32, i32, i32
  }
  func.func @transform_6(%arg0: i32) -> (i32, i32, i32) {
    %c0_i32 = arith.constant 0 : i32
    %c0_i32_0 = arith.constant 0 : i32
    %c0_i32_1 = arith.constant 0 : i32
    %c0_i32_2 = arith.constant 0 : i32
    return %c0_i32, %c0_i32_0, %c0_i32_1 : i32, i32, i32
  }
  func.func @transform_7(%arg0: i32) -> (i32, i32, i32) {
    %c0_i32 = arith.constant 0 : i32
    %c0_i32_0 = arith.constant 0 : i32
    %c0_i32_1 = arith.constant 0 : i32
    %c0_i32_2 = arith.constant 0 : i32
    return %c0_i32, %c0_i32_0, %c0_i32_1 : i32, i32, i32
  }
  func.func @transform_8(%arg0: i32) -> (i32, i32, i32) {
    %c0_i32 = arith.constant 0 : i32
    %c0_i32_0 = arith.constant 0 : i32
    %c0_i32_1 = arith.constant 0 : i32
    %c0_i32_2 = arith.constant 0 : i32
    return %c0_i32, %c0_i32_0, %c0_i32_1 : i32, i32, i32
  }
  func.func @transform_9(%arg0: i32) -> (i32, i32, i32) {
    %c0_i32 = arith.constant 0 : i32
    %c0_i32_0 = arith.constant 0 : i32
    %c0_i32_1 = arith.constant 0 : i32
    %c0_i32_2 = arith.constant 0 : i32
    return %c0_i32, %c0_i32_0, %c0_i32_1 : i32, i32, i32
  }
  func.func @transform_10(%arg0: i32) -> (i32, i32, i32) {
    %c0_i32 = arith.constant 0 : i32
    %c0_i32_0 = arith.constant 0 : i32
    %c0_i32_1 = arith.constant 0 : i32
    %c0_i32_2 = arith.constant 0 : i32
    return %c0_i32, %c0_i32_0, %c0_i32_1 : i32, i32, i32
  }
  func.func @transform_11(%arg0: i32) -> (i32, i32, i32) {
    %c0_i32 = arith.constant 0 : i32
    %c0_i32_0 = arith.constant 0 : i32
    %c0_i32_1 = arith.constant 0 : i32
    %c0_i32_2 = arith.constant 0 : i32
    return %c0_i32, %c0_i32_0, %c0_i32_1 : i32, i32, i32
  }
  func.func @transform_12(%arg0: i32) -> (i32, i32, i32) {
    %c0_i32 = arith.constant 0 : i32
    %c0_i32_0 = arith.constant 0 : i32
    %c0_i32_1 = arith.constant 0 : i32
    return %arg0, %c0_i32, %c0_i32_0 : i32, i32, i32
  }
  func.func @transform_13(%arg0: i32) -> (i32, i32, i32, i32) {
    %c0_i32 = arith.constant 0 : i32
    %c0_i32_0 = arith.constant 0 : i32
    %c0_i32_1 = arith.constant 0 : i32
    %c0_i32_2 = arith.constant 0 : i32
    return %arg0, %c0_i32, %c0_i32_0, %c0_i32_1 : i32, i32, i32, i32
  }
}

</mosaic_0001>

<bundles_post_ra>
// kernel: nodetaskhead_forward.1
= control target key start
LH: loop header
LB: loop body
LE: loop exit
PB: predicated region body
PF: predicated region fallthrough
CT: control target
= control target key end

     0   :  { %s6424_s0 = inlined_call_operand.vmem [shape: f32[2,8,32], index: 0, kind: input, shape index: {}]   ;;  %s6425_s1 = inlined_call_operand.vmem [shape: f32[2,3,8,1], index: 1, kind: input, shape index: {}]   ;;  %s6426_s2 = inlined_call_operand.vmem [shape: f32[2,3,1,8], index: 2, kind: input, shape index: {}]   ;;  %s6427_s3 = inlined_call_operand.vmem [shape: f32[2,4,8,8], index: 3, kind: input, shape index: {}]   ;;  %s6428_s4 = inlined_call_operand.vmem [shape: f32[2,8,1], index: 4, kind: input, shape index: {}]   ;;  %s6429_s5 = inlined_call_operand.vmem [shape: f32[2,1,8], index: 5, kind: input, shape index: {}]   ;;  %s6430_s6 = inlined_call_operand.vmem [shape: f32[4,32,8], index: 6, kind: input, shape index: {}]   ;;  %s6431_s7 = inlined_call_operand.vmem [shape: f32[4,32,8], index: 7, kind: input, shape index: {}]   ;;  %s6432_s8 = inlined_call_operand.vmem [shape: f32[4,32,8], index: 8, kind: input, shape index: {}]   ;;  %s6433_s9 = inlined_call_operand.vmem [shape: f32[4,32,8], index: 9, kind: input, shape index: {}]   ;;  %s6434_s10 = inlined_call_operand.vmem [shape: f32[4,8,32], index: 10, kind: input, shape index: {}]   ;;  %s6435_s11 = inlined_call_operand.vmem [shape: f32[4,8,32], index: 11, kind: input, shape index: {}]   ;;  %s6436_s12 = inlined_call_operand.hbm [shape: f32[2,8,32], index: 12, kind: output, shape index: {0}]   ;;  %s6437_s13 = inlined_call_operand.hbm [shape: f32[2,3,8,32], index: 13, kind: output, shape index: {1}]  }
   0x1   :  { %6439 = sst [smem:[#allocation10_spill]] %s6424_s0 }
   0x2   :  { %6440 = sst [smem:[#allocation11_spill]] %s6425_s1 }
   0x3   :  { %6441 = sst [smem:[#allocation12_spill]] %s6426_s2 }
   0x4   :  { %19 = vsyncpa [#allocation3], 0 }
   0x5   :  { %21 = vsyncpa [#allocation3 + $0x1], 0 }
   0x6   :  { %22 = vsyncpa [#allocation5], 0 }
   0x7   :  { %24 = vsyncpa [#allocation5 + $0x1], 0  ;;  %s5638_s25 = smov 0   ;;  %s5640_s26 = smov 0  }
   0x8   :  { %s5642_s27 = smov 0   ;;  %s5644_s28 = smov 0  }
   0x9 LB: > { %6442 = sst [smem:[#allocation8_spill]] %s5555_s27  ;;  %s5659_s29 = sadd.s32 4294967295, %s5559_s28   ;;  %s5559_s28 = sphi %s5644_s28, %s6454_s28   ;;  %s5555_s27 = sphi %s5642_s27, %s6451_s27   ;;  %s5551_s26 = sphi %s5640_s26, %s6453_s26   ;;  %s5547_s25 = sphi %s5638_s25, %s6452_s25  }
   0xa   : > { %s4747_s30 = sadd.s32 4294967294, %s5559_s28   ;;  %s5663_s14 = sadd.s32 1, %s5559_s28  }
   0xb   : > { %s319_s15 = sadd.s32 1, %s5555_s27  ;;  %s316_s16 = ssub.s32 %s5559_s28, %s5663_s14 }
   0xc   : > { %p329_p0 = scmp.ne.s32.totalorder %s5555_s27, %s5551_s26  ;;  %p317_p1 = scmp.eq.s32.totalorder %s316_s16, 0 }
   0xd   : > { %p330_p2 = scmp.eq.s32.totalorder %s5659_s29, 1  ;;  %p335_p3 = scmp.ne.s32.totalorder %s5551_s26, %s5547_s25 }
   0xe   : > { %p336_p4 = scmp.eq.s32.totalorder %s4747_s30, 1  ;;  %p4750_p7 = scmp.ge.s32.totalorder %s5559_s28, 1 }
   0xf   : > { %s5674_s17 = scalar_select %p317_p1, %s5555_s27, %s319_s15  }
  0x10   : > { %p5676_p5 = por %p330_p2, %p329_p0  ;;  %p5680_p6 = por %p336_p4, %p335_p3 }
  0x11   : > { %6443 = sst [smem:[#allocation9_spill]] %s5674_s17  ;;  %p441_p8 = scmp.lt.s32.totalorder %s5559_s28, 3 }
  0x13   : > { %p442_p9 = pnand %p4750_p7, %p441_p8 }
  0x14   : > { %p510_p10 = scmp.lt.s32.totalorder (!%p442_p9), %s5659_s29, 1  ;;  %s6446_s0 = sld [smem:[#allocation10_spill]] (!%p442_p9) }
  0x15   : > { %445 = sbr.rel (%p442_p9) target bundleno = 4302 (0x10ce), region = 68  ;;  %s6447_s1 = sld [smem:[#allocation11_spill]] (!%p442_p9) }
  0x16   : > { %s6448_s2 = sld [smem:[#allocation12_spill]] (!%p442_p9)  ;;  %s5564_s22 = smov (!%p442_p9), [#allocation2]  }
  0x1a   : > { %v623_v0 = vld [vmem:[%s6430_s6 + $0x18] sm:$0xff]  ;;  %v5561_v2 = vmov 0.0   ;;  %v622_v3 = vld [vmem:[%s6430_s6 + $0x10] sm:$0xff]  ;;  %s5702_s20 = scalar_select %p510_p10, %s5659_s29, 1  ;;  %v621_v5 = vld [vmem:[%s6430_s6 + $0x8] sm:$0xff]  ;;  %vm624_vm0 = vcmask 261120   ;;  %v605_v31 = vlaneseq }
  0x1b   : > { %v702_v1 = vld [vmem:[%s6431_s7 + $0x18] sm:$0xff]  ;;  %5037 = vmatprep.subr.mxu0 %v5561_v2  ;;  %5048 = vmatprep.subr.mxu1 %v5561_v2  ;;  %v701_v4 = vld [vmem:[%s6431_s7 + $0x10] sm:$0xff]  ;;  %v700_v6 = vld [vmem:[%s6431_s7 + $0x8] sm:$0xff]  ;;  %vm5562_vm1 = vmmov 0   ;;  %v5563_v14 = vmov 0   ;;  %vm922_vm3 = vcmask 64512  }
  0x1c   : > { %5038 = vmatpush3.msra.mxu0 %v623_v0  ;;  %5049 = vmatpush3.msra.mxu1 %v702_v1  ;;  %s4752_s30 = sshll.u32 %s5702_s20, 3  ;;  %v620_v7 = vld [vmem:[%s6430_s6] sm:$0xff]  ;;  %v776_v10 = vld [vmem:[%s6432_s8 + $0x18] sm:$0xff]  ;;  %v775_v11 = vld [vmem:[%s6432_s8 + $0x10] sm:$0xff]  ;;  %s5394_s17 = smul.u32 24, %s5702_s20  ;;  %v606_v33 = vshrl.u32 %v605_v31, 7 }
  0x1d   : > { %5039 = vmatprep.subr.mxu0 %v5561_v2  ;;  %5050 = vmatprep.subr.mxu1 %v5561_v2  ;;  %s5723_s21 = scalar_lea.vmem %s6446_s0, %s4752_s30  ;;  %v699_v8 = vld [vmem:[%s6431_s7] sm:$0xff]  ;;  %v774_v12 = vld [vmem:[%s6432_s8 + $0x8] sm:$0xff]  ;;  %s531_s16 = scalar_lea.vmem %s6428_s4, %s4752_s30  ;;  %v850_v27 = vld [vmem:[%s6433_s9 + $0x18] sm:$0xff] }
  0x1e   : > { %5040 = vmatpush3.msra.mxu0 %v622_v3  ;;  %5051 = vmatpush3.msra.mxu1 %v701_v4  ;;  %v5731_v9 = vld [vmem:[%s5723_s21] sm:$0xff]  ;;  %s518_s27 = scalar_lea.vmem %s6447_s1, %s5394_s17  ;;  %v849_v28 = vld [vmem:[%s6433_s9 + $0x10] sm:$0xff]  ;;  %v848_v29 = vld [vmem:[%s6433_s9 + $0x8] sm:$0xff]  ;;  %s534_s24 = scalar_lea.vmem %s6429_s5, %s5702_s20  ;;  %v607_v34 = vsub.s32 0, %v606_v33 }
  0x1f   : > { %5041 = vmatprep.subr.mxu0 %v5561_v2  ;;  %5052 = vmatprep.subr.mxu1 %v5561_v2  ;;  %v773_v13 = vld [vmem:[%s6432_s8] sm:$0xff]  ;;  %v4758_v18 = vld [vmem:[%s518_s27 + $0x8] sm:$0xff]  ;;  %v4761_v19 = vld [vmem:[%s518_s27 + $0x10] sm:$0xff]  ;;  %s4884_s15 = sshll.u32 %s5702_s20, 5  ;;  %s6333_s17 = sand.u32 1, %s5551_s26  }
  0x20   : > { %5042 = vmatpush3.msra.mxu0 %v621_v5  ;;  %5053 = vmatpush3.msra.mxu1 %v700_v6  ;;  %v536_v15 = vld [vmem:[%s531_s16] sm:$0xff]  ;;  %s5813_s23 = scalar_lea.vmem %s6427_s3, %s4884_s15  ;;  %v4787_v33 = vld [vmem:[%s6432_s8 + $0x38] sm:$0xff]  ;;  %s4565_s30 = scalar_lea.sflag [#allocation3], %s6333_s17 }
  0x21   : > { %5043 = vmatprep.subr.mxu0 %v5561_v2  ;;  %5054 = vmatprep.subr.mxu1 %v5561_v2  ;;  %v538_v16 = vld [vmem:[%s518_s27] sm:$0xff]  ;;  %vm596_vm2 = vcmp.gt.f32.partialorder %v536_v15, 0.5  ;;  %s5395_s27 = smul.u32 3, %s5702_s20  ;;  %s4880_s20 = sshll.u32 %s5659_s29, 7 }
  0x22   : > { %5044 = vmatpush3.msra.mxu0 %v620_v7  ;;  %5045 = vmatprep.mubr.msk.f32.mxu0 %vm5562_vm1, %v5561_v2  ;;  %v597_v17 = vsel %vm596_vm2, 1, %v5563_v14  ;;  %v847_v30 = vld [vmem:[%s6433_s9] sm:$0xff]  ;;  %s5473_s0 = sshll.u32 %s5564_s22, 4  ;;  %s5474_s0 = int_to_ptr.vmem [resolvable:$false] %s5473_s0 }
  0x23   : > { %5055 = vmatpush3.msra.mxu1 %v699_v8  ;;  %5056 = vmatprep.mubr.msk.f32.mxu1 %vm5562_vm1, %v5561_v2  ;;  %v537_v32 = vld [vmem:[%s534_s24] sm:$0x1]  ;;  %s522_s24 = scalar_lea.vmem %s6448_s2, %s5395_s27  ;;  %s6342_s27 = scalar_lea.hbm %s6436_s12, %s4880_s20 }
  0x24   : > { %5046 = vmatmul.mubr.msk.f32.vlgmr.msra.gmra.mxu0 %vm624_vm0, %v5731_v9  ;;  %5057 = vmatmul.mubr.msk.f32.vlgmr.msra.gmra.mxu1 %vm624_vm0, %v5731_v9  ;;  %vm603_vm4 = vcmp.gt.f32.partialorder %v537_v32, 0.5  ;;  %v921_v37 = vld [vmem:[%s5813_s23] sm:$0xff]  ;;  %s5475_s20 = scalar_lea.vmem %s5474_s0, 256 }
  0x25   : > { %5059 = vmatprep.subr.mxu0 %v5561_v2  ;;  %5067 = vmatprep.mubr.msk.f32.mxu0 %vm5562_vm1, %v5561_v2  ;;  %v604_v35 = vsel %vm603_vm4, 1, %v5563_v14  ;;  %v4757_v54 = vld [vmem:[%s522_s24] ss:$0 sm:$0xff]  ;;  %v4760_v55 = vld [vmem:[%s522_s24 + $0x1] ss:$0 sm:$0xff] }
  0x26   : > { %5060 = vmatpush3.msra.mxu0 %v776_v10  ;;  %5070 = vmatprep.subr.mxu1 %v5561_v2  ;;  %v5815_v36 = vrot.slane %v604_v35, %v607_v34  ;;  %v4763_v58 = vld [vmem:[%s522_s24 + $0x2] ss:$0 sm:$0xff]  ;;  %v4786_v34 = vld [vmem:[%s6432_s8 + $0x30] sm:$0xff]  ;;  %v4785_v35 = vld [vmem:[%s6432_s8 + $0x28] sm:$0xff]  ;;  %s4751_s24 = sshll.u32 %s6333_s17, 3 }
  0x27   : > { %5061 = vmatprep.subr.mxu0 %v5561_v2  ;;  %5078 = vmatprep.mubr.msk.f32.mxu1 %vm5562_vm1, %v5561_v2  ;;  %v4774_v31 = vld [vmem:[%s6430_s6 + $0x20] sm:$0xff]  ;;  %s502_s15 = scalar_lea.vmem [#allocation2], %s4751_s24 }
  0x28   : > { %5062 = vmatpush3.msra.mxu0 %v775_v11  ;;  %5447 = vset.pattern.permute.xlu1 %v5563_v14  ;;  %vm609_vm5 = vcmp.eq.s32.totalorder %v5815_v36, 1  ;;  %v4779_v32 = vld [vmem:[%s6431_s7 + $0x20] sm:$0xff]  ;;  %v4868_v36 = vld [vmem:[%s6435_s11 + $0x18] sm:$0xff]  ;;  %s4583_s16 = sshll.u32 %s502_s15, 4  ;;  %s6344_s16 = int_to_ptr.vmem [resolvable:$true] %s4583_s16 }
  0x29   : > { %5063 = vmatprep.subr.mxu0 %v5561_v2  ;;  %5446 = vset.pattern.permute.xlu0 %v5563_v14  ;;  %s5469_s24 = scalar_lea.vmem %s6344_s16, 128  ;;  %p5476_p0 = scmp.lt.s32.totalorder %s6344_s16, %s5474_s0 }
  0x2a   : > { %5064 = vmatpush3.msra.mxu0 %v774_v12  ;;  %542 = vperm.xlu1 %5447, %v538_v16   ;;  %p5470_p11 = scmp.ne.s32.totalorder %s6344_s16, %s5469_s24  ;;  %p5477_p1 = scmp.lt.s32.totalorder %s5475_s20, %s5469_s24 }
  0x2b   : > { %5065 = vmatprep.subr.mxu0 %v5561_v2  ;;  %599 = vperm.xlu0 %5446, %v597_v17  }
  0x2c   : > { %5066 = vmatpush3.msra.mxu0 %v773_v13  ;;  %5071 = vmatpush3.msra.mxu1 %v850_v27  ;;  %v4782_v27 = vld [vmem:[%s6431_s7 + $0x38] sm:$0xff]  ;;  %p5471_p12 = pnand %p5470_p11, %p5676_p5  ;;  %p5478_p2 = por %p5477_p1, %p5476_p0 }
  0x2d   : > { %5068 = vmatmul.mubr.msk.f32.vlgmr.msra.gmra.mxu0 %vm624_vm0, %v5731_v9  ;;  %5081 = vmatprep.subr.mxu0 %v5561_v2 }
  0x2e   : > { %5083 = vmatprep.mubr.msk.f32.mxu0 %vm5562_vm1, %v5561_v2  ;;  %558 = vperm.xlu1 %5447, %v4758_v18   ;;  %p5472_p13 = pneg %p5471_p12 }
  0x2f   : > { %5072 = vmatprep.subr.mxu1 %v5561_v2 }
  0x30   : > { %5073 = vmatpush3.msra.mxu1 %v849_v28  ;;  %v4781_v28 = vld [vmem:[%s6431_s7 + $0x30] sm:$0xff]  ;;  %p5479_p3 = pnand %p5478_p2, %p5472_p13 }
  0x31   : > { %5074 = vmatprep.subr.mxu1 %v5561_v2 }
  0x32   : > { %574 = vperm.xlu1 %5447, %v4761_v19   ;;  %5075 = vmatpush3.msra.mxu1 %v848_v29  ;;  %v4775_v29 = vld [vmem:[%s6430_s6 + $0x28] sm:$0xff] }
  0x33   : > { %5076 = vmatprep.subr.mxu1 %v5561_v2 }
  0x34   : > { %5077 = vmatpush3.msra.mxu1 %v847_v30  ;;  %v4780_v30 = vld [vmem:[%s6431_s7 + $0x28] sm:$0xff] }
  0x35   : > { %5079 = vmatmul.mubr.msk.f32.vlgmr.msra.gmra.mxu1 %vm624_vm0, %v5731_v9  ;;  %5086 = vmatprep.subr.mxu1 %v5561_v2 }
  0x36   : > { %5088 = vmatprep.mubr.msk.f32.mxu1 %vm5562_vm1, %v5561_v2 }
  0xa5   : > { %v543_v52 = vpop.permute.xlu1 %542 }
  0xa6   : > { %v5818_v38 = vpop.permute.xlu0 %599  ;;  %v551_v56 = vsub.f32 %v543_v52, %v4757_v54  ;;  %v4792_v54 = vld [vmem:[%s6433_s9 + $0x38] sm:$0xff] }
  0xa7   : > { %vm601_vm6 = vcmp.eq.s32.totalorder %v5818_v38, 1 }
  0xa8   : > { %v584_v60 = vmul.f32 %v551_v56, %v551_v56 }
  0xa9   : > { %v559_v53 = vpop.permute.xlu1 %558 }
  0xaa   : > { %v567_v57 = vsub.f32 %v559_v53, %v4760_v55  ;;  %v4791_v55 = vld [vmem:[%s6433_s9 + $0x30] sm:$0xff] }
  0xac   : > { %v585_v61 = vmul.f32 %v567_v57, %v567_v57 }
  0xad   : > { %v575_v59 = vpop.permute.xlu1 %574 }
  0xae   : > { %v583_v62 = vsub.f32 %v575_v59, %v4763_v58  ;;  %v586_v63 = vadd.f32 %v585_v61, %v584_v60  ;;  %v4794_v58 = vld [vmem:[%s5813_s23 + $0x8] sm:$0xff] }
  0xb0   : > { %v587_v0 = vmul.f32 %v583_v62, %v583_v62 }
  0xb2   : > { %v588_v1 = vadd.f32 %v587_v0, %v586_v63 }
  0xb4   : > { %vm591_vm7 = vcmp.eq.f32.partialorder %v588_v1, inf  ;;  %v594_v5 = vand.u32 2147483648, %v588_v1  ;;  %vm593_vm8 = vcmp.eq.f32.partialorder %v588_v1, 0.0 }
  0xe4   : > { %v694_v20 = vpop.f32.mrf.mxu0  ;;  %v769_v21 = vpop.f32.mrf.mxu1 }
  0xe5   : > { %v698_v22 = vmul.f32 0.35355338, %v694_v20  ;;  %5082 = vmatpush3.xpose.msk.msra.mxu0 %vm922_vm3, %v769_v21 }
  0xe6   : > { %v5047_v23 = vpop.f32.mrf.mxu0  ;;  %v5058_v24 = vpop.f32.mrf.mxu1  ;;  %5091 = vmatprep.subr.mxu0 %v5561_v2 }
  0xe7   : > { %v4777_v23 = vld [vmem:[%s6430_s6 + $0x38] sm:$0xff] }
  0xe8   : > { %5084 = vmatmul.mubr.msk.f32.vlgmr.msra.gmra.mxu0 %vm922_vm3, %v698_v22 }
  0xe9   : > { %5093 = vmatprep.mubr.msk.f32.mxu0 %vm5562_vm1, %v5561_v2 }
  0xed   : > { %v5781_v25 = vpop.f32.mrf.mxu0 }
  0xee   : > { %5092 = vmatpush3.msra.mxu0 %v5781_v25 }
  0xef   : > { %v5069_v26 = vpop.f32.mrf.mxu0  ;;  %5101 = vmatprep.subr.mxu0 %v5561_v2 }
  0xf5   : > { %v917_v50 = vpop.f32.mrf.mxu1 }
  0xf6   : > { %5087 = vmatpush3.msra.mxu1 %v917_v50 }
  0xf7   : > { %v5080_v51 = vpop.f32.mrf.mxu1  ;;  %5096 = vmatprep.subr.mxu1 %v5561_v2 }
 0x1a8   : > { %v995_v39 = vpop.f32.mrf.mxu0 }
 0x1a9   : > { %v996_v40 = vadd.f32 %v995_v39, %v921_v37  ;;  %v4784_v37 = vld [vmem:[%s6432_s8 + $0x20] sm:$0xff] }
 0x1aa   : > { %v5085_v41 = vpop.f32.mrf.mxu0 }
 0x1ab   : > { %v999_v42 = vsel %vm609_vm5, -3.4028235e+38, %v996_v40 }
 0x1ac   : > { %v1000_v43 = vsel %vm601_vm6, -3.4028235e+38, %v999_v42 }
 0x1ad   : > { %v1001_v44 = vsel %vm922_vm3, %v1000_v43, -inf }
 0x1ae   : > { %1002 = vmax.xlane.f32.xlu0 %v1001_v44 }
 0x237   : > { %v1003_v45 = vpop.xlane.xlu0 %1002 }
 0x238   : > { %v1004_v46 = vsub.f32 %v1000_v43, %v1003_v45 }
 0x23a   : > { %v1005_v47 = vmul.f32 1.442695, %v1004_v46 }
 0x23c   : > { %5448 = vpow2.f32 %v1005_v47 }
 0x23d   : > { %5450 = vrsqrt.f32 %v588_v1 }
 0x249   : > { %v5449_v48 = vpop.eup %5448 }
 0x24a   : > { %v1007_v49 = vsel %vm922_vm3, %v5449_v48, 0.0  ;;  %v5451_v3 = vpop.eup %5450 }
 0x24b   : > { %1008 = vadd.xlane.f32.xlu1 %v1007_v49  ;;  %v590_v4 = vmul.f32 %v5451_v3, %v588_v1 }
 0x24d   : > { %v592_v6 = vsel %vm591_vm7, %v588_v1, %v590_v4 }
 0x24e   : > { %v595_v7 = vsel %vm593_vm8, %v594_v5, %v592_v6 }
 0x24f   : > { %v602_v8 = vsel %vm601_vm6, 1000000.0, %v595_v7 }
 0x250   : > { %v610_v10 = vsel %vm609_vm5, 1000000.0, %v602_v8 }
 0x251   : > { %v611_v11 = vadd.f32 1.0, %v610_v10  ;;  %v4798_v10 = vld [vmem:[%s6435_s11 + $0x8] sm:$0xff] }
 0x253   : > { %5452 = vrcp.f32 %v611_v11 }
 0x260   : > { %v5453_v13 = vpop.eup %5452 }
 0x261   : > { %v614_v14 = vmul.f32 %v5453_v13, %v551_v56  ;;  %v616_v16 = vmul.f32 %v5453_v13, %v567_v57  ;;  %v618_v19 = vmul.f32 %v5453_v13, %v583_v62  ;;  %v4790_v56 = vld [vmem:[%s6433_s9 + $0x28] sm:$0xff]  ;;  %v4789_v57 = vld [vmem:[%s6433_s9 + $0x20] sm:$0xff] }
 0x263   : > { %v5839_v18 = vsel %vm601_vm6, 0.0, %v614_v14  ;;  %v5848_v21 = vsel %vm601_vm6, 0.0, %v616_v16  ;;  %v5861_v24 = vsel %vm601_vm6, 0.0, %v618_v19  ;;  %v1085_v14 = vld [vmem:[%s6435_s11] sm:$0xff] }
 0x264   : > { %v1160_v19 = vld [vmem:[%s6434_s10] sm:$0xff] }
 0x2d4   : > { %v1009_v12 = vpop.xlane.xlu1 %1008 }
 0x2d5   : > { %5454 = vrcp.f32 %v1009_v12 }
 0x2e2   : > { %v5455_v15 = vpop.eup %5454 }
 0x2e3   : > { %v1011_v17 = vmul.f32 %v5455_v15, %v5449_v48 }
 0x2e5   : > { %5089 = vmatmul.mubr.msk.f32.vlgmr.msra.gmra.mxu1 %vm922_vm3, %v1011_v17  ;;  %v1086_v20 = vmul.f32 %v1011_v17, %v5839_v18  ;;  %v1161_v22 = vmul.f32 %v1011_v17, %v5848_v21  ;;  %v1235_v26 = vmul.f32 %v1011_v17, %v5861_v24 }
 0x2e6   : > { %5097 = vmatpush3.msra.mxu1 %v5781_v25  ;;  %5098 = vmatprep.mubr.msk.f32.mxu1 %vm5562_vm1, %v5561_v2 }
 0x2e7   : > { %5094 = vmatmul.mubr.msk.f32.vlgmr.msra.gmra.mxu0 %vm922_vm3, %v1086_v20  ;;  %5106 = vmatprep.subr.mxu1 %v5561_v2 }
 0x2e8   : > { %5102 = vmatpush3.msra.mxu0 %v5781_v25  ;;  %5103 = vmatprep.mubr.msk.f32.mxu0 %vm5562_vm1, %v5561_v2  ;;  %v4776_v25 = vld [vmem:[%s6430_s6 + $0x30] sm:$0xff] }
 0x2e9   : > { %5099 = vmatmul.mubr.msk.f32.vlgmr.msra.gmra.mxu1 %vm922_vm3, %v1161_v22  ;;  %5117 = vmatprep.subr.mxu0 %v5561_v2 }
 0x2ea   : > { %5107 = vmatpush3.msra.mxu1 %v4777_v23  ;;  %5114 = vmatprep.mubr.msk.f32.mxu1 %vm5562_vm1, %v5561_v2  ;;  %v4802_v23 = vld [vmem:[%s6434_s10 + $0x8] sm:$0xff] }
 0x2eb   : > { %5104 = vmatmul.mubr.msk.f32.vlgmr.msra.gmra.mxu0 %vm922_vm3, %v1235_v26  ;;  %5108 = vmatprep.subr.mxu1 %v5561_v2 }
 0x2ec   : > { %5118 = vmatpush3.msra.mxu0 %v4782_v27  ;;  %5109 = vmatpush3.msra.mxu1 %v4776_v25 }
 0x2ed   : > { %5119 = vmatprep.subr.mxu0 %v5561_v2  ;;  %5110 = vmatprep.subr.mxu1 %v5561_v2 }
 0x2ee   : > { %5120 = vmatpush3.msra.mxu0 %v4781_v28  ;;  %5111 = vmatpush3.msra.mxu1 %v4775_v29 }
 0x2ef   : > { %5121 = vmatprep.subr.mxu0 %v5561_v2  ;;  %5112 = vmatprep.subr.mxu1 %v5561_v2 }
 0x2f0   : > { %5122 = vmatpush3.msra.mxu0 %v4780_v30  ;;  %5113 = vmatpush3.msra.mxu1 %v4774_v31 }
 0x2f1   : > { %5123 = vmatprep.subr.mxu0 %v5561_v2  ;;  %5115 = vmatmul.mubr.msk.f32.vlgmr.msra.gmra.mxu1 %vm624_vm0, %v5731_v9 }
 0x2f2   : > { %5124 = vmatpush3.msra.mxu0 %v4779_v32  ;;  %5125 = vmatprep.mubr.msk.f32.mxu0 %vm5562_vm1, %v5561_v2 }
 0x2f3   : > { %5126 = vmatmul.mubr.msk.f32.vlgmr.msra.gmra.mxu0 %vm624_vm0, %v5731_v9  ;;  %5128 = vmatprep.subr.mxu1 %v5561_v2 }
 0x2f4   : > { %5136 = vmatprep.mubr.msk.f32.mxu1 %vm5562_vm1, %v5561_v2  ;;  %5139 = vmatprep.subr.mxu0 %v5561_v2 }
 0x2f5   : > { %5147 = vmatprep.mubr.msk.f32.mxu0 %vm5562_vm1, %v5561_v2  ;;  %5129 = vmatpush3.msra.mxu1 %v4787_v33 }
 0x2f6   : > { %5130 = vmatprep.subr.mxu1 %v5561_v2  ;;  %5140 = vmatpush3.msra.mxu0 %v4792_v54 }
 0x2f7   : > { %5131 = vmatpush3.msra.mxu1 %v4786_v34  ;;  %5141 = vmatprep.subr.mxu0 %v5561_v2 }
 0x2f8   : > { %5132 = vmatprep.subr.mxu1 %v5561_v2  ;;  %5142 = vmatpush3.msra.mxu0 %v4791_v55  ;;  %v4824_v55 = vld [vmem:[%s6432_s8 + $0x58] sm:$0xff] }
 0x2f9   : > { %5133 = vmatpush3.msra.mxu1 %v4785_v35  ;;  %5143 = vmatprep.subr.mxu0 %v5561_v2 }
 0x2fa   : > { %5134 = vmatprep.subr.mxu1 %v5561_v2  ;;  %5144 = vmatpush3.msra.mxu0 %v4790_v56  ;;  %v4823_v56 = vld [vmem:[%s6432_s8 + $0x50] sm:$0xff] }
 0x2fb   : > { %5135 = vmatpush3.msra.mxu1 %v4784_v37  ;;  %5145 = vmatprep.subr.mxu0 %v5561_v2 }
 0x2fc   : > { %5137 = vmatmul.mubr.msk.f32.vlgmr.msra.gmra.mxu1 %vm624_vm0, %v5731_v9  ;;  %5150 = vmatprep.subr.mxu1 %v5561_v2 }
 0x2fd   : > { %5152 = vmatprep.mubr.msk.f32.mxu1 %vm5562_vm1, %v5561_v2  ;;  %5146 = vmatpush3.msra.mxu0 %v4789_v57  ;;  %v4822_v57 = vld [vmem:[%s6432_s8 + $0x48] sm:$0xff] }
 0x2fe   : > { %5148 = vmatmul.mubr.msk.f32.vlgmr.msra.gmra.mxu0 %vm624_vm0, %v5731_v9  ;;  %5155 = vmatprep.subr.mxu0 %v5561_v2 }
 0x2ff   : > { %5157 = vmatprep.mubr.msk.f32.mxu0 %vm5562_vm1, %v5561_v2 }
 0x3a5   : > { %v5928_v39 = vpop.f32.mrf.mxu1 }
 0x3a7   : > { %v5090_v40 = vpop.f32.mrf.mxu1  ;;  %v5930_v41 = vpop.f32.mrf.mxu0 }
 0x3a9   : > { %v5095_v42 = vpop.f32.mrf.mxu0  ;;  %v5932_v43 = vpop.f32.mrf.mxu1 }
 0x3aa   : > { %v4818_v42 = vld [vmem:[%s6431_s7 + $0x50] sm:$0xff] }
 0x3ab   : > { %v5100_v44 = vpop.f32.mrf.mxu1  ;;  %v5934_v45 = vpop.f32.mrf.mxu0 }
 0x3ac   : > { %v4816_v44 = vld [vmem:[%s6431_s7 + $0x40] sm:$0xff] }
 0x3ad   : > { %v5105_v46 = vpop.f32.mrf.mxu0 }
 0x3b1   : > { %v1380_v47 = vpop.f32.mrf.mxu1 }
 0x3b2   : > { %v1384_v48 = vmul.f32 0.35355338, %v1380_v47  ;;  %v4814_v47 = vld [vmem:[%s6430_s6 + $0x58] sm:$0xff] }
 0x3b3   : > { %v1456_v49 = vpop.f32.mrf.mxu0  ;;  %v5116_v50 = vpop.f32.mrf.mxu1 }
 0x3b4   : > { %5151 = vmatpush3.xpose.msk.msra.mxu1 %vm922_vm3, %v1456_v49  ;;  %v4813_v49 = vld [vmem:[%s6430_s6 + $0x50] sm:$0xff] }
 0x3b5   : > { %v5127_v51 = vpop.f32.mrf.mxu0  ;;  %5160 = vmatprep.subr.mxu1 %v5561_v2 }
 0x3b6   : > { %v4812_v51 = vld [vmem:[%s6430_s6 + $0x48] sm:$0xff] }
 0x3b7   : > { %5153 = vmatmul.mubr.msk.f32.vlgmr.msra.gmra.mxu1 %vm922_vm3, %v1384_v48 }
 0x3b8   : > { %5162 = vmatprep.mubr.msk.f32.mxu1 %vm5562_vm1, %v5561_v2  ;;  %5161 = vmatpush3.msra.mxu1 %v4798_v10  ;;  %v4831_v10 = vld [vmem:[%s5813_s23 + $0x10] sm:$0xff] }
 0x3b9   : > { %5170 = vmatprep.subr.mxu1 %v5561_v2 }
 0x3bc   : > { %v5941_v52 = vpop.f32.mrf.mxu1 }
 0x3be   : > { %v5138_v53 = vpop.f32.mrf.mxu1  ;;  %v1606_v7 = vpop.f32.mrf.mxu0 }
 0x3bf   : > { %5156 = vmatpush3.msra.mxu0 %v1606_v7  ;;  %v4811_v53 = vld [vmem:[%s6430_s6 + $0x40] sm:$0xff]  ;;  %v4827_v7 = vld [vmem:[%s6433_s9 + $0x48] sm:$0xff] }
 0x3c0   : > { %v5149_v8 = vpop.f32.mrf.mxu0  ;;  %5165 = vmatprep.subr.mxu0 %v5561_v2 }
 0x3c1   : > { %v4826_v8 = vld [vmem:[%s6433_s9 + $0x40] sm:$0xff] }
 0x477   : > { %v1684_v59 = vpop.f32.mrf.mxu1 }
 0x478   : > { %v1685_v60 = vadd.f32 %v4794_v58, %v1684_v59  ;;  %v4821_v58 = vld [vmem:[%s6432_s8 + $0x40] sm:$0xff] }
 0x479   : > { %v5154_v61 = vpop.f32.mrf.mxu1 }
 0x47a   : > { %v1688_v62 = vsel %vm609_vm5, -3.4028235e+38, %v1685_v60 }
 0x47b   : > { %v1689_v63 = vsel %vm601_vm6, -3.4028235e+38, %v1688_v62 }
 0x47c   : > { %v1690_v0 = vsel %vm922_vm3, %v1689_v63, -inf }
 0x47d   : > { %1691 = vmax.xlane.f32.xlu0 %v1690_v0 }
 0x506   : > { %v1692_v1 = vpop.xlane.xlu0 %1691 }
 0x507   : > { %v1693_v3 = vsub.f32 %v1689_v63, %v1692_v1 }
 0x509   : > { %v1694_v4 = vmul.f32 1.442695, %v1693_v3 }
 0x50b   : > { %5456 = vpow2.f32 %v1694_v4 }
 0x518   : > { %v5457_v5 = vpop.eup %5456 }
 0x519   : > { %v1696_v6 = vsel %vm922_vm3, %v5457_v5, 0.0 }
 0x51a   : > { %1697 = vadd.xlane.f32.xlu0 %v1696_v6  ;;  %v4828_v6 = vld [vmem:[%s6433_s9 + $0x50] sm:$0xff] }
 0x5a3   : > { %v1698_v11 = vpop.xlane.xlu0 %1697 }
 0x5a4   : > { %5458 = vrcp.f32 %v1698_v11 }
 0x5b1   : > { %v5459_v12 = vpop.eup %5458 }
 0x5b2   : > { %v1700_v13 = vmul.f32 %v5459_v12, %v5457_v5  ;;  %v4829_v5 = vld [vmem:[%s6433_s9 + $0x58] sm:$0xff] }
 0x5b4   : > { %5158 = vmatmul.mubr.msk.f32.vlgmr.msra.gmra.mxu0 %vm922_vm3, %v1700_v13  ;;  %v1922_v17 = vmul.f32 %v1700_v13, %v5839_v18  ;;  %v2144_v29 = vmul.f32 %v1700_v13, %v5848_v21  ;;  %v2364_v37 = vmul.f32 %v1700_v13, %v5861_v24 }
 0x5b5   : > { %5166 = vmatpush3.msra.mxu0 %v1085_v14  ;;  %5167 = vmatprep.mubr.msk.f32.mxu0 %vm5562_vm1, %v5561_v2 }
 0x5b6   : > { %5175 = vmatprep.subr.mxu0 %v5561_v2 }
 0x5b8   : > { %5168 = vmatmul.mubr.msk.f32.vlgmr.msra.gmra.mxu0 %vm922_vm3, %v5928_v39 }
 0x5b9   : > { %5177 = vmatprep.mubr.msk.f32.mxu0 %vm5562_vm1, %v5561_v2  ;;  %5176 = vmatpush3.msra.mxu0 %v4802_v23 }
 0x5ba   : > { %5185 = vmatprep.subr.mxu0 %v5561_v2 }
 0x674   : > { %v1770_v15 = vpop.f32.mrf.mxu0 }
 0x675   : > { %5163 = vmatmul.mubr.msk.f32.vlgmr.msra.gmra.mxu1 %vm922_vm3, %v1770_v15 }
 0x676   : > { %5171 = vmatpush3.msra.mxu1 %v5941_v52  ;;  %v5159_v16 = vpop.f32.mrf.mxu0  ;;  %5172 = vmatprep.mubr.msk.f32.mxu1 %vm5562_vm1, %v5561_v2 }
 0x677   : > { %5180 = vmatprep.subr.mxu1 %v5561_v2 }
 0x678   : > { %v5995_v20 = vpop.f32.mrf.mxu0 }
 0x679   : > { %5173 = vmatmul.mubr.msk.f32.vlgmr.msra.gmra.mxu1 %vm922_vm3, %v1922_v17 }
 0x67a   : > { %v5169_v22 = vpop.f32.mrf.mxu0  ;;  %5181 = vmatpush3.msra.mxu1 %v1160_v19  ;;  %5182 = vmatprep.mubr.msk.f32.mxu1 %vm5562_vm1, %v5561_v2 }
 0x67b   : > { %5190 = vmatprep.subr.mxu1 %v5561_v2 }
 0x67d   : > { %5183 = vmatmul.mubr.msk.f32.vlgmr.msra.gmra.mxu1 %vm922_vm3, %v5930_v41  ;;  %v4819_v41 = vld [vmem:[%s6431_s7 + $0x58] sm:$0xff] }
 0x67e   : > { %5192 = vmatprep.mubr.msk.f32.mxu1 %vm5562_vm1, %v5561_v2  ;;  %5191 = vmatpush3.msra.mxu1 %v4802_v23 }
 0x67f   : > { %5200 = vmatprep.subr.mxu1 %v5561_v2 }
 0x735   : > { %v6010_v26 = vpop.f32.mrf.mxu1 }
 0x737   : > { %v5164_v27 = vpop.f32.mrf.mxu1 }
 0x739   : > { %v1992_v25 = vpop.f32.mrf.mxu1 }
 0x73a   : > { %5178 = vmatmul.mubr.msk.f32.vlgmr.msra.gmra.mxu0 %vm922_vm3, %v1992_v25 }
 0x73b   : > { %5186 = vmatpush3.msra.mxu0 %v5941_v52  ;;  %v5174_v28 = vpop.f32.mrf.mxu1  ;;  %5187 = vmatprep.mubr.msk.f32.mxu0 %vm5562_vm1, %v5561_v2 }
 0x73c   : > { %5195 = vmatprep.subr.mxu0 %v5561_v2 }
 0x73d   : > { %v6018_v30 = vpop.f32.mrf.mxu1 }
 0x73e   : > { %5188 = vmatmul.mubr.msk.f32.vlgmr.msra.gmra.mxu0 %vm922_vm3, %v2144_v29  ;;  %v4835_v29 = vld [vmem:[%s6435_s11 + $0x10] sm:$0xff] }
 0x73f   : > { %v5184_v31 = vpop.f32.mrf.mxu1  ;;  %5196 = vmatpush3.msra.mxu0 %v1160_v19  ;;  %5197 = vmatprep.mubr.msk.f32.mxu0 %vm5562_vm1, %v5561_v2 }
 0x740   : > { %5205 = vmatprep.subr.mxu0 %v5561_v2 }
 0x742   : > { %5198 = vmatmul.mubr.msk.f32.vlgmr.msra.gmra.mxu0 %vm922_vm3, %v5932_v43  ;;  %v4817_v43 = vld [vmem:[%s6431_s7 + $0x48] sm:$0xff] }
 0x743   : > { %5206 = vmatpush3.msra.mxu0 %v4802_v23  ;;  %5207 = vmatprep.mubr.msk.f32.mxu0 %vm5562_vm1, %v5561_v2 }
 0x744   : > { %5215 = vmatprep.subr.mxu0 %v5561_v2 }
 0x7fa   : > { %v6029_v32 = vpop.f32.mrf.mxu0 }
 0x7fc   : > { %v5179_v33 = vpop.f32.mrf.mxu0 }
 0x7fe   : > { %v2214_v34 = vpop.f32.mrf.mxu0 }
 0x7ff   : > { %5193 = vmatmul.mubr.msk.f32.vlgmr.msra.gmra.mxu1 %vm922_vm3, %v2214_v34 }
 0x800   : > { %5201 = vmatpush3.msra.mxu1 %v5941_v52  ;;  %v5189_v35 = vpop.f32.mrf.mxu0  ;;  %5202 = vmatprep.mubr.msk.f32.mxu1 %vm5562_vm1, %v5561_v2 }
 0x801   : > { %5210 = vmatprep.subr.mxu1 %v5561_v2 }
 0x802   : > { %v6037_v39 = vpop.f32.mrf.mxu0 }
 0x803   : > { %5203 = vmatmul.mubr.msk.f32.vlgmr.msra.gmra.mxu1 %vm922_vm3, %v2364_v37 }
 0x804   : > { %v5199_v40 = vpop.f32.mrf.mxu0  ;;  %5211 = vmatpush3.msra.mxu1 %v1160_v19  ;;  %5212 = vmatprep.mubr.msk.f32.mxu1 %vm5562_vm1, %v5561_v2 }
 0x805   : > { %5226 = vmatprep.subr.mxu1 %v5561_v2 }
 0x807   : > { %5213 = vmatmul.mubr.msk.f32.vlgmr.msra.gmra.mxu1 %vm922_vm3, %v5934_v45 }
 0x808   : > { %5234 = vmatprep.mubr.msk.f32.mxu1 %vm5562_vm1, %v5561_v2  ;;  %5227 = vmatpush3.msra.mxu1 %v4819_v41  ;;  %v4847_v41 = vld [vmem:[%s6430_s6 + $0x78] sm:$0xff] }
 0x809   : > { %5228 = vmatprep.subr.mxu1 %v5561_v2 }
 0x80a   : > { %5229 = vmatpush3.msra.mxu1 %v4818_v42  ;;  %v4846_v42 = vld [vmem:[%s6430_s6 + $0x70] sm:$0xff] }
 0x80b   : > { %5230 = vmatprep.subr.mxu1 %v5561_v2 }
 0x80c   : > { %5231 = vmatpush3.msra.mxu1 %v4817_v43  ;;  %v4845_v43 = vld [vmem:[%s6430_s6 + $0x68] sm:$0xff] }
 0x80d   : > { %5232 = vmatprep.subr.mxu1 %v5561_v2 }
 0x80e   : > { %5233 = vmatpush3.msra.mxu1 %v4816_v44  ;;  %v4844_v44 = vld [vmem:[%s6430_s6 + $0x60] sm:$0xff] }
 0x80f   : > { %5235 = vmatmul.mubr.msk.f32.vlgmr.msra.gmra.mxu1 %vm624_vm0, %v5731_v9  ;;  %5248 = vmatprep.subr.mxu1 %v5561_v2 }
 0x810   : > { %5256 = vmatprep.mubr.msk.f32.mxu1 %vm5562_vm1, %v5561_v2  ;;  %5249 = vmatpush3.msra.mxu1 %v4829_v5 }
 0x811   : > { %5250 = vmatprep.subr.mxu1 %v5561_v2 }
 0x812   : > { %5251 = vmatpush3.msra.mxu1 %v4828_v6 }
 0x813   : > { %5252 = vmatprep.subr.mxu1 %v5561_v2 }
 0x814   : > { %5253 = vmatpush3.msra.mxu1 %v4827_v7 }
 0x815   : > { %5254 = vmatprep.subr.mxu1 %v5561_v2 }
 0x816   : > { %5255 = vmatpush3.msra.mxu1 %v4826_v8  ;;  %v2141_v8 = vadd.f32 %v6018_v30, %v6029_v32 }
 0x817   : > { %5257 = vmatmul.mubr.msk.f32.vlgmr.msra.gmra.mxu1 %vm624_vm0, %v5731_v9  ;;  %5264 = vmatprep.subr.mxu1 %v5561_v2 }
 0x818   : > { %5266 = vmatprep.mubr.msk.f32.mxu1 %vm5562_vm1, %v5561_v2 }
 0x8bf   : > { %v6067_v45 = vpop.f32.mrf.mxu1 }
 0x8c1   : > { %v5194_v46 = vpop.f32.mrf.mxu1 }
 0x8c2   : > { %v4838_v46 = vld [vmem:[%s6434_s10 + $0x10] sm:$0xff] }
 0x8c3   : > { %v2434_v48 = vpop.f32.mrf.mxu1 }
 0x8c4   : > { %5208 = vmatmul.mubr.msk.f32.vlgmr.msra.gmra.mxu0 %vm922_vm3, %v2434_v48 }
 0x8c5   : > { %5216 = vmatpush3.msra.mxu0 %v4814_v47  ;;  %v5204_v50 = vpop.f32.mrf.mxu1  ;;  %5223 = vmatprep.mubr.msk.f32.mxu0 %vm5562_vm1, %v5561_v2 }
 0x8c6   : > { %5217 = vmatprep.subr.mxu0 %v5561_v2 }
 0x8c7   : > { %5218 = vmatpush3.msra.mxu0 %v4813_v49  ;;  %v6082_v52 = vpop.f32.mrf.mxu1 }
 0x8c8   : > { %5219 = vmatprep.subr.mxu0 %v5561_v2 }
 0x8c9   : > { %5220 = vmatpush3.msra.mxu0 %v4812_v51  ;;  %v5214_v54 = vpop.f32.mrf.mxu1 }
 0x8ca   : > { %5221 = vmatprep.subr.mxu0 %v5561_v2  ;;  %v4852_v54 = vld [vmem:[%s6431_s7 + $0x78] sm:$0xff] }
 0x8cb   : > { %5222 = vmatpush3.msra.mxu0 %v4811_v53 }
 0x8cc   : > { %5224 = vmatmul.mubr.msk.f32.vlgmr.msra.gmra.mxu0 %vm624_vm0, %v5731_v9  ;;  %5237 = vmatprep.subr.mxu0 %v5561_v2 }
 0x8cd   : > { %5238 = vmatpush3.msra.mxu0 %v4824_v55  ;;  %5245 = vmatprep.mubr.msk.f32.mxu0 %vm5562_vm1, %v5561_v2 }
 0x8ce   : > { %5239 = vmatprep.subr.mxu0 %v5561_v2 }
 0x8cf   : > { %5240 = vmatpush3.msra.mxu0 %v4823_v56  ;;  %v2731_v59 = vpop.f32.mrf.mxu1  ;;  %v4851_v56 = vld [vmem:[%s6431_s7 + $0x70] sm:$0xff] }
 0x8d0   : > { %5241 = vmatprep.subr.mxu0 %v5561_v2 }
 0x8d1   : > { %5242 = vmatpush3.msra.mxu0 %v4822_v57  ;;  %v5236_v60 = vpop.f32.mrf.mxu1 }
 0x8d2   : > { %5243 = vmatprep.subr.mxu0 %v5561_v2  ;;  %v4857_v60 = vld [vmem:[%s6432_s8 + $0x78] sm:$0xff] }
 0x8d3   : > { %5244 = vmatpush3.msra.mxu0 %v4821_v58  ;;  %v4850_v58 = vld [vmem:[%s6431_s7 + $0x68] sm:$0xff] }
 0x8d4   : > { %5246 = vmatmul.mubr.msk.f32.vlgmr.msra.gmra.mxu0 %vm624_vm0, %v5731_v9  ;;  %5259 = vmatprep.subr.mxu0 %v5561_v2 }
 0x8d5   : > { %5260 = vmatpush3.xpose.msk.msra.mxu0 %vm922_vm3, %v2731_v59  ;;  %5261 = vmatprep.mubr.msk.f32.mxu0 %vm5562_vm1, %v5561_v2  ;;  %v4849_v59 = vld [vmem:[%s6431_s7 + $0x60] sm:$0xff] }
 0x8d6   : > { %5269 = vmatprep.subr.mxu0 %v5561_v2 }
 0x8d7   : > { %v2881_v25 = vpop.f32.mrf.mxu1 }
 0x8d8   : > { %5265 = vmatpush3.msra.mxu1 %v2881_v25  ;;  %v4864_v25 = vld [vmem:[%s5813_s23 + $0x18] sm:$0xff] }
 0x8d9   : > { %v5258_v28 = vpop.f32.mrf.mxu1  ;;  %5274 = vmatprep.subr.mxu1 %v5561_v2 }
 0x984   : > { %v6116_v61 = vpop.f32.mrf.mxu0 }
 0x986   : > { %v5209_v62 = vpop.f32.mrf.mxu0 }
 0x987   : > { %v4856_v62 = vld [vmem:[%s6432_s8 + $0x70] sm:$0xff] }
 0x98c   : > { %v2655_v63 = vpop.f32.mrf.mxu0 }
 0x98d   : > { %v2659_v0 = vmul.f32 0.35355338, %v2655_v63  ;;  %v4855_v63 = vld [vmem:[%s6432_s8 + $0x68] sm:$0xff] }
 0x98e   : > { %v5225_v1 = vpop.f32.mrf.mxu0 }
 0x98f   : > { %5262 = vmatmul.mubr.msk.f32.vlgmr.msra.gmra.mxu0 %vm922_vm3, %v2659_v0  ;;  %v4854_v0 = vld [vmem:[%s6432_s8 + $0x60] sm:$0xff] }
 0x990   : > { %5271 = vmatprep.mubr.msk.f32.mxu0 %vm5562_vm1, %v5561_v2  ;;  %5270 = vmatpush3.msra.mxu0 %v4835_v29 }
 0x991   : > { %5279 = vmatprep.subr.mxu0 %v5561_v2 }
 0x994   : > { %v2806_v3 = vpop.f32.mrf.mxu0 }
 0x996   : > { %v5247_v4 = vpop.f32.mrf.mxu0 }
 0x997   : > { %v1919_v4 = vadd.f32 %v5995_v20, %v6010_v26  ;;  %v2581_v20 = vadd.f32 %v6082_v52, %v6116_v61  ;;  %v4862_v52 = vld [vmem:[%s6433_s9 + $0x78] sm:$0xff]  ;;  %v4861_v61 = vld [vmem:[%s6433_s9 + $0x70] sm:$0xff] }
 0xa4f   : > { %v2959_v11 = vpop.f32.mrf.mxu0 }
 0xa50   : > { %v2960_v12 = vadd.f32 %v4831_v10, %v2959_v11 }
 0xa51   : > { %v5263_v13 = vpop.f32.mrf.mxu0 }
 0xa52   : > { %v2963_v14 = vsel %vm609_vm5, -3.4028235e+38, %v2960_v12  ;;  %v2361_v12 = vadd.f32 %v6037_v39, %v6067_v45 }
 0xa53   : > { %v2964_v15 = vsel %vm601_vm6, -3.4028235e+38, %v2963_v14 }
 0xa54   : > { %v2965_v16 = vsel %vm922_vm3, %v2964_v15, -inf }
 0xa55   : > { %2966 = vmax.xlane.f32.xlu0 %v2965_v16 }
 0xade   : > { %v2967_v17 = vpop.xlane.xlu0 %2966 }
 0xadf   : > { %v2968_v19 = vsub.f32 %v2964_v15, %v2967_v17 }
 0xae1   : > { %v2969_v22 = vmul.f32 1.442695, %v2968_v19 }
 0xae3   : > { %5460 = vpow2.f32 %v2969_v22  ;;  %v4860_v22 = vld [vmem:[%s6433_s9 + $0x68] sm:$0xff] }
 0xaf0   : > { %v5461_v23 = vpop.eup %5460 }
 0xaf1   : > { %v2971_v27 = vsel %vm922_vm3, %v5461_v23, 0.0 }
 0xaf2   : > { %2972 = vadd.xlane.f32.xlu0 %v2971_v27  ;;  %v5468_v27 = vld [vmem:[%s5723_s21] sm:$0xff] }
 0xb7b   : > { %v2973_v31 = vpop.xlane.xlu0 %2972 }
 0xb7c   : > { %5462 = vrcp.f32 %v2973_v31 }
 0xb89   : > { %v5463_v33 = vpop.eup %5462 }
 0xb8a   : > { %v2975_v34 = vmul.f32 %v5463_v33, %v5461_v23  ;;  %v4859_v23 = vld [vmem:[%s6433_s9 + $0x60] sm:$0xff] }
 0xb8c   : > { %5267 = vmatmul.mubr.msk.f32.vlgmr.msra.gmra.mxu1 %vm922_vm3, %v2975_v34  ;;  %v3125_v35 = vmul.f32 %v2975_v34, %v5839_v18  ;;  %v3275_v37 = vmul.f32 %v2975_v34, %v5848_v21  ;;  %v3423_v40 = vmul.f32 %v2975_v34, %v5861_v24 }
 0xb8d   : > { %5275 = vmatpush3.msra.mxu1 %v2806_v3  ;;  %5276 = vmatprep.mubr.msk.f32.mxu1 %vm5562_vm1, %v5561_v2 }
 0xb8e   : > { %5284 = vmatprep.subr.mxu1 %v5561_v2 }
 0xb90   : > { %5277 = vmatmul.mubr.msk.f32.vlgmr.msra.gmra.mxu1 %vm922_vm3, %v3125_v35 }
 0xb91   : > { %5285 = vmatpush3.msra.mxu1 %v2806_v3  ;;  %5286 = vmatprep.mubr.msk.f32.mxu1 %vm5562_vm1, %v5561_v2 }
 0xb92   : > { %5294 = vmatprep.subr.mxu1 %v5561_v2 }
 0xb94   : > { %5287 = vmatmul.mubr.msk.f32.vlgmr.msra.gmra.mxu1 %vm922_vm3, %v3275_v37 }
 0xb95   : > { %5295 = vmatpush3.msra.mxu1 %v2806_v3  ;;  %5296 = vmatprep.mubr.msk.f32.mxu1 %vm5562_vm1, %v5561_v2 }
 0xb96   : > { %5304 = vmatprep.subr.mxu1 %v5561_v2 }
 0xb98   : > { %5297 = vmatmul.mubr.msk.f32.vlgmr.msra.gmra.mxu1 %vm922_vm3, %v3423_v40 }
 0xb99   : > { %5312 = vmatprep.mubr.msk.f32.mxu1 %vm5562_vm1, %v5561_v2  ;;  %5305 = vmatpush3.msra.mxu1 %v4847_v41 }
 0xb9a   : > { %5306 = vmatprep.subr.mxu1 %v5561_v2 }
 0xb9b   : > { %5307 = vmatpush3.msra.mxu1 %v4846_v42 }
 0xb9c   : > { %5308 = vmatprep.subr.mxu1 %v5561_v2 }
 0xb9d   : > { %5309 = vmatpush3.msra.mxu1 %v4845_v43 }
 0xb9e   : > { %5310 = vmatprep.subr.mxu1 %v5561_v2 }
 0xb9f   : > { %5311 = vmatpush3.msra.mxu1 %v4844_v44 }
 0xba0   : > { %5313 = vmatmul.mubr.msk.f32.vlgmr.msra.gmra.mxu1 %vm624_vm0, %v5731_v9  ;;  %5326 = vmatprep.subr.mxu1 %v5561_v2 }
 0xba1   : > { %5334 = vmatprep.mubr.msk.f32.mxu1 %vm5562_vm1, %v5561_v2  ;;  %5327 = vmatpush3.msra.mxu1 %v4857_v60 }
 0xba2   : > { %5328 = vmatprep.subr.mxu1 %v5561_v2 }
 0xba3   : > { %5329 = vmatpush3.msra.mxu1 %v4856_v62 }
 0xba4   : > { %5330 = vmatprep.subr.mxu1 %v5561_v2 }
 0xba5   : > { %5331 = vmatpush3.msra.mxu1 %v4855_v63 }
 0xba6   : > { %5332 = vmatprep.subr.mxu1 %v5561_v2 }
 0xba7   : > { %5333 = vmatpush3.msra.mxu1 %v4854_v0 }
 0xba8   : > { %5335 = vmatmul.mubr.msk.f32.vlgmr.msra.gmra.mxu1 %vm624_vm0, %v5731_v9  ;;  %5348 = vmatprep.subr.mxu1 %v5561_v2 }
 0xba9   : > { %5350 = vmatprep.mubr.msk.f32.mxu1 %vm5562_vm1, %v5561_v2 }
 0xc4c   : > { %v3045_v47 = vpop.f32.mrf.mxu1 }
 0xc4d   : > { %5272 = vmatmul.mubr.msk.f32.vlgmr.msra.gmra.mxu0 %vm922_vm3, %v3045_v47 }
 0xc4e   : > { %v5268_v48 = vpop.f32.mrf.mxu1  ;;  %5280 = vmatpush3.msra.mxu0 %v4838_v46  ;;  %5281 = vmatprep.mubr.msk.f32.mxu0 %vm5562_vm1, %v5561_v2 }
 0xc4f   : > { %5289 = vmatprep.subr.mxu0 %v5561_v2 }
 0xc50   : > { %v3195_v49 = vpop.f32.mrf.mxu1 }
 0xc51   : > { %5282 = vmatmul.mubr.msk.f32.vlgmr.msra.gmra.mxu0 %vm922_vm3, %v3195_v49 }
 0xc52   : > { %v5278_v50 = vpop.f32.mrf.mxu1  ;;  %5290 = vmatpush3.msra.mxu0 %v4838_v46  ;;  %5291 = vmatprep.mubr.msk.f32.mxu0 %vm5562_vm1, %v5561_v2 }
 0xc53   : > { %5299 = vmatprep.subr.mxu0 %v5561_v2 }
 0xc54   : > { %v3345_v51 = vpop.f32.mrf.mxu1 }
 0xc55   : > { %5292 = vmatmul.mubr.msk.f32.vlgmr.msra.gmra.mxu0 %vm922_vm3, %v3345_v51 }
 0xc56   : > { %v5288_v53 = vpop.f32.mrf.mxu1  ;;  %5300 = vmatpush3.msra.mxu0 %v4838_v46  ;;  %5301 = vmatprep.mubr.msk.f32.mxu0 %vm5562_vm1, %v5561_v2 }
 0xc57   : > { %5315 = vmatprep.subr.mxu0 %v5561_v2 }
 0xc58   : > { %v3493_v55 = vpop.f32.mrf.mxu1 }
 0xc59   : > { %5302 = vmatmul.mubr.msk.f32.vlgmr.msra.gmra.mxu0 %vm922_vm3, %v3493_v55 }
 0xc5a   : > { %5316 = vmatpush3.msra.mxu0 %v4852_v54  ;;  %v5298_v57 = vpop.f32.mrf.mxu1  ;;  %5323 = vmatprep.mubr.msk.f32.mxu0 %vm5562_vm1, %v5561_v2 }
 0xc5b   : > { %5317 = vmatprep.subr.mxu0 %v5561_v2 }
 0xc5c   : > { %5318 = vmatpush3.msra.mxu0 %v4851_v56 }
 0xc5d   : > { %5319 = vmatprep.subr.mxu0 %v5561_v2 }
 0xc5e   : > { %5320 = vmatpush3.msra.mxu0 %v4850_v58 }
 0xc5f   : > { %5321 = vmatprep.subr.mxu0 %v5561_v2 }
 0xc60   : > { %5322 = vmatpush3.msra.mxu0 %v4849_v59  ;;  %v3642_v1 = vpop.f32.mrf.mxu1 }
 0xc61   : > { %5324 = vmatmul.mubr.msk.f32.vlgmr.msra.gmra.mxu0 %vm624_vm0, %v5731_v9  ;;  %5337 = vmatprep.subr.mxu0 %v5561_v2  ;;  %v3646_v19 = vmul.f32 0.35355338, %v3642_v1 }
 0xc62   : > { %5345 = vmatprep.mubr.msk.f32.mxu0 %vm5562_vm1, %v5561_v2  ;;  %v5314_v3 = vpop.f32.mrf.mxu1  ;;  %5338 = vmatpush3.msra.mxu0 %v4862_v52 }
 0xc63   : > { %5339 = vmatprep.subr.mxu0 %v5561_v2 }
 0xc64   : > { %5340 = vmatpush3.msra.mxu0 %v4861_v61 }
 0xc65   : > { %5341 = vmatprep.subr.mxu0 %v5561_v2 }
 0xc66   : > { %5342 = vmatpush3.msra.mxu0 %v4860_v22 }
 0xc67   : > { %5343 = vmatprep.subr.mxu0 %v5561_v2 }
 0xc68   : > { %v3793_v39 = vpop.f32.mrf.mxu1  ;;  %5344 = vmatpush3.msra.mxu0 %v4859_v23 }
 0xc69   : > { %5346 = vmatmul.mubr.msk.f32.vlgmr.msra.gmra.mxu0 %vm624_vm0, %v5468_v27  ;;  %5353 = vmatprep.subr.mxu0 %v5561_v2 }
 0xc6a   : > { %v5336_v45 = vpop.f32.mrf.mxu1  ;;  %5355 = vmatprep.mubr.msk.f32.mxu0 %vm5562_vm1, %v5561_v2 }
 0xd0d   : > { %v3120_v5 = vpop.f32.mrf.mxu0 }
 0xd0e   : > { %v6251_v6 = vadd.f32 %v3120_v5, %v1919_v4 }
 0xd0f   : > { %v5273_v7 = vpop.f32.mrf.mxu0 }
 0xd11   : > { %v3270_v10 = vpop.f32.mrf.mxu0 }
 0xd12   : > { %v6255_v11 = vadd.f32 %v3270_v10, %v2141_v8 }
 0xd13   : > { %v5283_v9 = vpop.f32.mrf.mxu0 }
 0xd15   : > { %v3418_v13 = vpop.f32.mrf.mxu0 }
 0xd16   : > { %v6259_v14 = vadd.f32 %v3418_v13, %v2361_v12 }
 0xd17   : > { %v5293_v15 = vpop.f32.mrf.mxu0 }
 0xd19   : > { %v3566_v26 = vpop.f32.mrf.mxu0 }
 0xd1a   : > { %v6263_v16 = vadd.f32 %v3566_v26, %v2581_v20 }
 0xd1b   : > { %v5303_v17 = vpop.f32.mrf.mxu0 }
 0xd21   : > { %v3718_v30 = vpop.f32.mrf.mxu0 }
 0xd22   : > { %5349 = vmatpush3.xpose.msk.msra.mxu1 %vm922_vm3, %v3718_v30 }
 0xd23   : > { %v5325_v32 = vpop.f32.mrf.mxu0  ;;  %5358 = vmatprep.subr.mxu1 %v5561_v2 }
 0xd25   : > { %5351 = vmatmul.mubr.msk.f32.vlgmr.msra.gmra.mxu1 %vm922_vm3, %v3646_v19 }
 0xd26   : > { %5360 = vmatprep.mubr.msk.f32.mxu1 %vm5562_vm1, %v5561_v2  ;;  %5359 = vmatpush3.msra.mxu1 %v4868_v36 }
 0xd27   : > { %5368 = vmatprep.subr.mxu1 %v5561_v2 }
 0xd29   : > { %v3868_v44 = vpop.f32.mrf.mxu0 }
 0xd2a   : > { %5354 = vmatpush3.msra.mxu0 %v3868_v44 }
 0xd2b   : > { %v5347_v46 = vpop.f32.mrf.mxu0  ;;  %5363 = vmatprep.subr.mxu0 %v5561_v2 }
 0xde5   : > { %v3946_v28 = vpop.f32.mrf.mxu1 }
 0xde6   : > { %v3947_v29 = vadd.f32 %v4864_v25, %v3946_v28 }
 0xde7   : > { %v5352_v31 = vpop.f32.mrf.mxu1 }
 0xde8   : > { %v3950_v33 = vsel %vm609_vm5, -3.4028235e+38, %v3947_v29 }
 0xde9   : > { %v3951_v34 = vsel %vm601_vm6, -3.4028235e+38, %v3950_v33 }
 0xdea   : > { %v3952_v35 = vsel %vm922_vm3, %v3951_v34, -inf }
 0xdeb   : > { %3953 = vmax.xlane.f32.xlu1 %v3952_v35 }
 0xe74   : > { %v3954_v37 = vpop.xlane.xlu1 %3953 }
 0xe75   : > { %v3955_v40 = vsub.f32 %v3951_v34, %v3954_v37 }
 0xe77   : > { %v3956_v41 = vmul.f32 1.442695, %v3955_v40 }
 0xe79   : > { %5464 = vpow2.f32 %v3956_v41 }
 0xe86   : > { %v5465_v42 = vpop.eup %5464 }
 0xe87   : > { %v3958_v43 = vsel %vm922_vm3, %v5465_v42, 0.0 }
 0xe88   : > { %3959 = vadd.xlane.f32.xlu0 %v3958_v43 }
 0xf11   : > { %v3960_v38 = vpop.xlane.xlu0 %3959 }
 0xf12   : > { %5466 = vrcp.f32 %v3960_v38 }
 0xf1f   : > { %v5467_v47 = vpop.eup %5466 }
 0xf20   : > { %v3962_v48 = vmul.f32 %v5467_v47, %v5465_v42 }
 0xf22   : > { %5356 = vmatmul.mubr.msk.f32.vlgmr.msra.gmra.mxu0 %vm922_vm3, %v3962_v48  ;;  %v4112_v49 = vmul.f32 %v3962_v48, %v5839_v18  ;;  %v4262_v50 = vmul.f32 %v3962_v48, %v5848_v21  ;;  %v4410_v51 = vmul.f32 %v3962_v48, %v5861_v24  ;;  %v4871_v18 = vld [vmem:[%s6434_s10 + $0x18] sm:$0xff] }
 0xf23   : > { %5364 = vmatpush3.msra.mxu0 %v3793_v39  ;;  %5365 = vmatprep.mubr.msk.f32.mxu0 %vm5562_vm1, %v5561_v2 }
 0xf24   : > { %5373 = vmatprep.subr.mxu0 %v5561_v2 }
 0xf26   : > { %5366 = vmatmul.mubr.msk.f32.vlgmr.msra.gmra.mxu0 %vm922_vm3, %v4112_v49 }
 0xf27   : > { %5374 = vmatpush3.msra.mxu0 %v3793_v39  ;;  %5375 = vmatprep.mubr.msk.f32.mxu0 %vm5562_vm1, %v5561_v2 }
 0xf28   : > { %5383 = vmatprep.subr.mxu0 %v5561_v2 }
 0xf2a   : > { %5376 = vmatmul.mubr.msk.f32.vlgmr.msra.gmra.mxu0 %vm922_vm3, %v4262_v50 }
 0xf2b   : > { %5384 = vmatpush3.msra.mxu0 %v3793_v39  ;;  %5385 = vmatprep.mubr.msk.f32.mxu0 %vm5562_vm1, %v5561_v2 }
 0xf2e   : > { %5386 = vmatmul.mubr.msk.f32.vlgmr.msra.gmra.mxu0 %vm922_vm3, %v4410_v51 }
 0xfe2   : > { %v4032_v53 = vpop.f32.mrf.mxu0 }
 0xfe3   : > { %5361 = vmatmul.mubr.msk.f32.vlgmr.msra.gmra.mxu1 %vm922_vm3, %v4032_v53 }
 0xfe4   : > { %v5357_v54 = vpop.f32.mrf.mxu0  ;;  %5369 = vmatpush3.msra.mxu1 %v4871_v18  ;;  %5370 = vmatprep.mubr.msk.f32.mxu1 %vm5562_vm1, %v5561_v2 }
 0xfe5   : > { %5378 = vmatprep.subr.mxu1 %v5561_v2 }
 0xfe6   : > { %v4182_v21 = vpop.f32.mrf.mxu0 }
 0xfe7   : > { %5371 = vmatmul.mubr.msk.f32.vlgmr.msra.gmra.mxu1 %vm922_vm3, %v4182_v21 }
 0xfe8   : > { %v5367_v24 = vpop.f32.mrf.mxu0  ;;  %5379 = vmatpush3.msra.mxu1 %v4871_v18  ;;  %5380 = vmatprep.mubr.msk.f32.mxu1 %vm5562_vm1, %v5561_v2 }
 0xfe9   : > { %5388 = vmatprep.subr.mxu1 %v5561_v2 }
 0xfea   : > { %v4332_v55 = vpop.f32.mrf.mxu0 }
 0xfeb   : > { %5381 = vmatmul.mubr.msk.f32.vlgmr.msra.gmra.mxu1 %vm922_vm3, %v4332_v55 }
 0xfec   : > { %v5377_v56 = vpop.f32.mrf.mxu0  ;;  %5389 = vmatpush3.msra.mxu1 %v4871_v18  ;;  %5390 = vmatprep.mubr.msk.f32.mxu1 %vm5562_vm1, %v5561_v2 }
 0xfee   : > { %v4480_v57 = vpop.f32.mrf.mxu0 }
 0xfef   : > { %5391 = vmatmul.mubr.msk.f32.vlgmr.msra.gmra.mxu1 %vm922_vm3, %v4480_v57 }
 0xff0   : > { %v5387_v58 = vpop.f32.mrf.mxu0 }
0x10a3   : > { %v4107_v59 = vpop.f32.mrf.mxu1 }
0x10a4   : > { %v4111_v60 = vadd.f32 %v4107_v59, %v6251_v6 }
0x10a5   : > { %v5362_v2 = vpop.f32.mrf.mxu1 }
0x10a6   : > { %4558 = vst.msk [vmem:[%s502_s15] sm:$0xff] %vm624_vm0, %v4111_v60 }
0x10a7   : > { %v4257_v62 = vpop.f32.mrf.mxu1 }
0x10a8   : > { %5482 = shalt.err (!%p5479_p3)
}
0x10a9   : > { %s5483_s15 = scalar_lea.hbm %s6342_s27, 128  ;;  %s5487_s22 = scalar_lea.hbm %s6436_s12, 256 }
0x10aa   : > { %p5484_p4 = scmp.ne.s32.totalorder %s6342_s27, %s5483_s15  ;;  %p5488_p9 = scmp.lt.s32.totalorder %s6342_s27, %s6436_s12 }
0x10ab   : > { %p5489_p10 = scmp.lt.s32.totalorder %s5487_s22, %s5483_s15 }
0x10ac   : > { %p5485_p7 = pnand %p5484_p4, %p5676_p5 }
0x10ad   : > { %p5490_p11 = por %p5489_p10, %p5488_p9 }
0x10ae   : > { %p5486_p8 = pneg %p5485_p7 }
0x10b0   : > { %p5491_p12 = pnand %p5490_p11, %p5486_p8 }
0x10b2   : > { %5494 = shalt.err (!%p5491_p12)
}
0x10b3   : > { %5397 = dma.vmem_to_hbm [thread:$0]  (%p5676_p5), %s6344_s16, 128, %s6342_s27, %s4565_s30   ;;  %v4261_v63 = vadd.f32 %v4257_v62, %v6255_v11  ;;  %v5372_v0 = vpop.f32.mrf.mxu1 }
0x10b4   : > { %s6449_s0 = smul.u32 24, %s6333_s17  ;;  %s5565_s15 = smov [#allocation4]  }
0x10b5   : > { %v4405_v1 = vpop.f32.mrf.mxu1  ;;  %s5396_s2 = smul.u32 384, %s5659_s29  ;;  %s4570_s29 = scalar_lea.sflag [#allocation5], %s6333_s17 }
0x10b6   : > { %s509_s24 = scalar_lea.vmem [#allocation4], %s6449_s0  ;;  %v4409_v3 = vadd.f32 %v4405_v1, %v6259_v14  ;;  %s5499_s21 = sshll.u32 %s5565_s15, 4  ;;  %s5500_s21 = int_to_ptr.vmem [resolvable:$false] %s5499_s21 }
0x10b7   : > { %4559 = vst.msk [vmem:[%s509_s24] sm:$0xff] %vm624_vm0, %v4261_v63  ;;  %s4596_s1 = sshll.u32 %s509_s24, 4  ;;  %v5382_v4 = vpop.f32.mrf.mxu1  ;;  %s6380_s30 = scalar_lea.hbm %s6437_s13, %s5396_s2  ;;  %s6374_s1 = int_to_ptr.vmem [resolvable:$true] %s4596_s1 }
0x10b8   : > { %4877 = vst.msk [vmem:[%s509_s24 + $0x8] sm:$0xff] %vm624_vm0, %v4409_v3  ;;  %s5495_s20 = scalar_lea.vmem %s6374_s1, 384  ;;  %s5501_s23 = scalar_lea.vmem %s5500_s21, 768 }
0x10b9   : > { %v4553_v5 = vpop.f32.mrf.mxu1  ;;  %p5496_p13 = scmp.ne.s32.totalorder %s6374_s1, %s5495_s20  ;;  %p5502_p2 = scmp.lt.s32.totalorder %s6374_s1, %s5500_s21 }
0x10ba   : > { %v4557_v6 = vadd.f32 %v4553_v5, %v6263_v16  ;;  %p5503_p3 = scmp.lt.s32.totalorder %s5501_s23, %s5495_s20 }
0x10bb   : > { %v5392_v7 = vpop.f32.mrf.mxu1  ;;  %p5497_p0 = pnand %p5496_p13, %p5676_p5 }
0x10bc   : > { %4878 = vst.msk [vmem:[%s509_s24 + $0x10] sm:$0xff] %vm624_vm0, %v4557_v6  ;;  %p5504_p4 = por %p5503_p3, %p5502_p2 }
0x10bd   : > { %p5498_p1 = pneg %p5497_p0 }
0x10bf   : > { %p5505_p7 = pnand %p5504_p4, %p5498_p1 }
0x10c1   : > { %5508 = shalt.err (!%p5505_p7)
}
0x10c2   : > { %s5509_s22 = scalar_lea.hbm %s6380_s30, 384  ;;  %s5513_s2 = scalar_lea.hbm %s6437_s13, 768 }
0x10c3   : > { %p5510_p8 = scmp.ne.s32.totalorder %s6380_s30, %s5509_s22  ;;  %p5514_p11 = scmp.lt.s32.totalorder %s6380_s30, %s6437_s13 }
0x10c4   : > { %p5515_p12 = scmp.lt.s32.totalorder %s5513_s2, %s5509_s22 }
0x10c5   : > { %p5511_p9 = pnand %p5510_p8, %p5676_p5 }
0x10c6   : > { %p5516_p13 = por %p5515_p12, %p5514_p11 }
0x10c7   : > { %p5512_p10 = pneg %p5511_p9 }
0x10c9   : > { %p5517_p0 = pnand %p5516_p13, %p5512_p10 }
0x10cb   : > { %5520 = shalt.err (!%p5517_p0)
}
0x10cc   : > { %s5566_s20 = smov 128   ;;  %s5567_s15 = smov 8  }
0x10cd   : > { %5398 = dma.vmem_to_hbm [thread:$0]  (%p5676_p5), %s6374_s1, 384, %s6380_s30, %s4570_s29, %s5566_s20, %s5566_s20, %s5567_s15  }
0x10ce PF: > { %p5408_p1 = scmp.ge.s32.totalorder %s5559_s28, 2  ;;  %s4611_s21 = sand.u32 1, %s5547_s25  }
0x10cf   : > { %s4612_s23 = scalar_lea.sflag [#allocation3], %s4611_s21 }
0x10d0   : > { %p5402_p2 = pnand %p5408_p1, %p5680_p6 }
0x10d2   : > { %p5403_p3 = pneg %p5402_p2 }
0x10d4   : > { %5538 = dma.done.wait (%p5403_p3), %s4612_s23, 128  }
0x10d5   : > { %5540 = vsyncadd (%p5403_p3), %s4612_s23, 4294967168  ;;  %s4621_s22 = scalar_lea.sflag [#allocation5], %s4611_s21 }
0x10d6   : > { %5542 = dma.done.wait (%p5403_p3), %s4621_s22, 384  }
0x10d7   : > { %5544 = vsyncadd (%p5403_p3), %s4621_s22, 4294966912  ;;  %s6450_s18 = sld [smem:[#allocation8_spill]]  ;;  %p27_p5 = scmp.ge.s32.totalorder %s5663_s14, 4  }
0x10d8   : > { %s6451_s27 = sld [smem:[#allocation9_spill]]  ;;  %s6452_s25 = smov %s5551_s26 }
0x10d9   : > { %s6454_s28 = smov %s5663_s14  ;;  %29 = sbr.rel (!%p27_p5) target bundleno = 9 (0x9), region = 162 }
0x10dd   : > { %s6453_s26 = smov %s6450_s18 }
0x10de   :  { %4626 = vsyncpa [#allocation3], 1 }
0x10df   :  { %4628 = vsyncpa [#allocation3 + $0x1], 1 }
0x10e0   :  { %4629 = vsyncpa [#allocation5], 1 }
0x10e1   :  { %4631 = vsyncpa [#allocation5 + $0x1], 1 }

</bundles_post_ra>
